<compile_context>
chip_gen: v6e
topology: v6e:2x2x1
jax: 0.10.0
libtpu: 0.0.40
codegen_flags: <defaults>
</compile_context>

<pallas_src>
import functools

import jax
import jax.numpy as jnp
from jax.experimental import pallas as pl
from jax.experimental.pallas import tpu as pltpu

BN_EPS = 1e-5


def _round_up(x, m):
    return (x + m - 1) // m * m


# ----------------------------------------------------------------------------
# Fused matmul kernel:  out = maybe_relu((A @ B) * scale + shift)
# scale / shift are per output column (conv bias + eval-mode BN folded in).
# Grid = (M tiles, K tiles); K innermost, accumulated in VMEM scratch.
# ----------------------------------------------------------------------------
def _mm_kernel(a_ref, b_ref, scale_ref, shift_ref, o_ref, acc_ref, *, relu):
    @pl.when(pl.program_id(1) == 0)
    def _():
        acc_ref[...] = jnp.zeros_like(acc_ref)

    acc_ref[...] += jnp.dot(a_ref[...], b_ref[...],
                            preferred_element_type=jnp.float32)

    @pl.when(pl.program_id(1) == pl.num_programs(1) - 1)
    def _():
        out = acc_ref[...] * scale_ref[...] + shift_ref[...]
        if relu:
            out = jnp.maximum(out, 0.0)
        o_ref[...] = out.astype(o_ref.dtype)


def matmul_scale_shift(a, b, scale, shift, *, relu=False, tk=512):
    """a: (M, K), b: (K, N), scale/shift: (N,) -> maybe_relu((a@b)*scale+shift)."""
    M, K = a.shape
    K2, N = b.shape
    assert K == K2

    # M: full-dim block padded to a sublane multiple, or 128-row tiles when big.
    tm = min(_round_up(M, 8), 128)
    Mp = _round_up(M, tm)
    # K: 512-wide tiles (multiple of 128), padded only to the tile multiple.
    tk = min(tk, _round_up(K, 128))
    Kp = _round_up(K, tk)
    # N: unpadded full-dim block (legal even when < 128, e.g. 64 or 6).

    a_p = a.astype(jnp.float32)
    if (Mp, Kp) != (M, K):
        a_p = jnp.pad(a_p, ((0, Mp - M), (0, Kp - K)))
    b_p = b.astype(jnp.float32)
    if Kp != K:
        b_p = jnp.pad(b_p, ((0, Kp - K), (0, 0)))
    scale_r = scale.astype(jnp.float32).reshape(1, N)
    shift_r = shift.astype(jnp.float32).reshape(1, N)

    out = pl.pallas_call(
        functools.partial(_mm_kernel, relu=relu),
        out_shape=jax.ShapeDtypeStruct((Mp, N), jnp.float32),
        grid_spec=pltpu.PrefetchScalarGridSpec(
            num_scalar_prefetch=0,
            grid=(Mp // tm, Kp // tk),                 # K innermost (reduction)
            in_specs=[
                pl.BlockSpec((tm, tk), lambda i, k: (i, k)),
                pl.BlockSpec((tk, N), lambda i, k: (k, 0)),
                pl.BlockSpec((1, N), lambda i, k: (0, 0)),
                pl.BlockSpec((1, N), lambda i, k: (0, 0)),
            ],
            out_specs=pl.BlockSpec((tm, N), lambda i, k: (i, 0)),
            scratch_shapes=[pltpu.VMEM((tm, N), jnp.float32)],
        ),
        compiler_params=pltpu.CompilerParams(
            dimension_semantics=("parallel", "arbitrary")),
    )(a_p, b_p, scale_r, shift_r)
    return out[:M] if Mp != M else out


# ----------------------------------------------------------------------------
# Valid conv (padding=0) on NHWC activations via im2col (glue) + fused kernel.
# Weight stays in PyTorch (Cout, Cin, KH, KW) layout; the im2col column order
# (kh, kw, cin) is matched by a one-time weight permutation, so the dot product
# is bit-identical in structure to PyTorch's conv.
# ----------------------------------------------------------------------------
def conv2d_nhwc(x, w, scale, shift, *, relu):
    B, H, W, Cin = x.shape
    Cout, _, KH, KW = w.shape
    Hout, Wout = H - KH + 1, W - KW + 1
    cols = [x[:, i:i + Hout, j:j + Wout, :] for i in range(KH) for j in range(KW)]
    patches = jnp.concatenate(cols, axis=-1).reshape(B * Hout * Wout, KH * KW * Cin)
    w_mat = jnp.transpose(w, (2, 3, 1, 0)).reshape(KH * KW * Cin, Cout)
    out = matmul_scale_shift(patches, w_mat, scale, shift, relu=relu)
    return out.reshape(B, Hout, Wout, Cout)


def _fold_bn(conv_b, gamma, beta, mean, var):
    # y = ((conv(x) + b) - mean) / sqrt(var+eps) * gamma + beta = conv(x)*s + shift
    s = gamma * jax.lax.rsqrt(var + BN_EPS)
    shift = (conv_b - mean) * s + beta
    return s, shift


# ----------------------------------------------------------------------------
# FeatureRegression forward.
# TODO(synk): BatchNorm is modeled in eval mode with running statistics;
# PyTorch's default train-mode batch statistics are not reproduced.
# ----------------------------------------------------------------------------
def feature_regression_forward(params, x):
    """x: (B, 225, 15, 15) NCHW (PyTorch layout) -> theta (B, 6)."""
    B = x.shape[0]
    xh = jnp.transpose(x, (0, 2, 3, 1))                                  # NHWC once

    s1, sh1 = _fold_bn(params['conv1_b'], params['bn1_gamma'], params['bn1_beta'],
                       params['bn1_mean'], params['bn1_var'])
    y = conv2d_nhwc(xh, params['conv1_w'], s1, sh1, relu=True)           # (B, 9, 9, 128)

    s2, sh2 = _fold_bn(params['conv2_b'], params['bn2_gamma'], params['bn2_beta'],
                       params['bn2_mean'], params['bn2_var'])
    y = conv2d_nhwc(y, params['conv2_w'], s2, sh2, relu=True)            # (B, 5, 5, 64)

    # PyTorch flattens NCHW (c, h, w); we flatten NHWC (h, w, c) and permute
    # the linear weight columns to match, so the result is identical.
    Hout, Wout, Cout = y.shape[1], y.shape[2], y.shape[3]
    y_flat = y.reshape(B, Hout * Wout * Cout)
    lw = params['lin_w'].reshape(6, Cout, Hout, Wout)
    lw = jnp.transpose(lw, (0, 2, 3, 1)).reshape(6, Hout * Wout * Cout).T  # (1600, 6)
    theta = matmul_scale_shift(y_flat, lw,
                               jnp.ones((6,), jnp.float32), params['lin_b'],
                               relu=False)                               # (B, 6)
    return theta


# ----------------------------------------------------------------------------
# Synthetic deterministic parameters (PyTorch layouts).
# ----------------------------------------------------------------------------
def init_params(key):
    ks = jax.random.split(key, 14)
    p = {}
    p['conv1_w'] = jax.random.normal(ks[0], (128, 225, 7, 7), jnp.float32) * (2.0 / (225 * 49)) ** 0.5
    p['conv1_b'] = jax.random.normal(ks[1], (128,), jnp.float32) * 0.01
    p['bn1_gamma'] = 1.0 + 0.1 * jax.random.normal(ks[2], (128,), jnp.float32)
    p['bn1_beta'] = 0.1 * jax.random.normal(ks[3], (128,), jnp.float32)
    p['bn1_mean'] = 0.05 * jax.random.normal(ks[4], (128,), jnp.float32)
    p['bn1_var'] = 0.9 + 0.1 * jnp.abs(jax.random.normal(ks[5], (128,), jnp.float32))

    p['conv2_w'] = jax.random.normal(ks[6], (64, 128, 5, 5), jnp.float32) * (2.0 / (128 * 25)) ** 0.5
    p['conv2_b'] = jax.random.normal(ks[7], (64,), jnp.float32) * 0.01
    p['bn2_gamma'] = 1.0 + 0.1 * jax.random.normal(ks[8], (64,), jnp.float32)
    p['bn2_beta'] = 0.1 * jax.random.normal(ks[9], (64,), jnp.float32)
    p['bn2_mean'] = 0.05 * jax.random.normal(ks[10], (64,), jnp.float32)
    p['bn2_var'] = 0.9 + 0.1 * jnp.abs(jax.random.normal(ks[11], (64,), jnp.float32))

    p['lin_w'] = jax.random.normal(ks[12], (6, 64 * 5 * 5), jnp.float32) * (1.0 / 1600.0) ** 0.5
    p['lin_b'] = jax.random.normal(ks[13], (6,), jnp.float32) * 0.01
    return p


if __name__ == "__main__":
    key = jax.random.PRNGKey(0)
    kp, kx = jax.random.split(key)
    params = init_params(kp)
    # Smallest input consistent with the module: 225 channels, 15x15 spatial.
    x = jax.random.normal(kx, (2, 225, 15, 15), jnp.float32)

    forward = jax.jit(feature_regression_forward)
    theta = jax.block_until_ready(forward(params, x))

    assert theta.shape == (2, 6), theta.shape
    assert bool(jnp.all(jnp.isfinite(theta)))
    print("KERNEL_OK")
</pallas_src>

<mosaic_0001>
module attributes {stable_mosaic.version = 11 : i64} {
  func.func @_mm_kernel(%arg0: i32, %arg1: i32, %arg2: memref<128x512xf32, #tpu.memory_space<vmem>>, %arg3: memref<512x128xf32, #tpu.memory_space<vmem>>, %arg4: memref<1x128xf32, #tpu.memory_space<vmem>>, %arg5: memref<1x128xf32, #tpu.memory_space<vmem>>, %arg6: memref<128x128xf32, #tpu.memory_space<vmem>>, %arg7: memref<128x128xf32, #tpu.memory_space<vmem>>) attributes {dimension_semantics = [#tpu.dimension_semantics<parallel>, #tpu.dimension_semantics<arbitrary>], iteration_bounds = array<i64: 2, 22>, scalar_prefetch = 0 : i64, scratch_operands = 1 : i64, tpu.core_type = #tpu.core_type<tc>, window_params = [{transform_indices = @transform_0, window_bounds = array<i64: 128, 512>}, {transform_indices = @transform_1, window_bounds = array<i64: 512, 128>}, {pipeline_mode = #tpu.pipeline_mode<synchronous>, transform_indices = @transform_2, window_bounds = array<i64: 1, 128>}, {pipeline_mode = #tpu.pipeline_mode<synchronous>, transform_indices = @transform_3, window_bounds = array<i64: 1, 128>}, {transform_indices = @transform_4, window_bounds = array<i64: 128, 128>}]} {
    %c0_i32 = arith.constant 0 : i32
    %0 = arith.cmpi eq, %arg1, %c0_i32 : i32
    %1 = arith.extui %0 : i1 to i32
    %c0_i32_0 = arith.constant 0 : i32
    %2 = arith.cmpi ne, %1, %c0_i32_0 : i32
    scf.if %2 {
      %cst_9 = arith.constant 0.000000e+00 : f32
      %12 = vector.broadcast %cst_9 : f32 to vector<128x128xf32>
      %c0_10 = arith.constant 0 : index
      %c0_11 = arith.constant 0 : index
      %13 = vector.load %arg7[%c0_10, %c0_11] : memref<128x128xf32, #tpu.memory_space<vmem>>, vector<128x128xf32>
      tpu.vector_store %arg7[%c0_10, %c0_11], %12 {strides = array<i32>} : memref<128x128xf32, #tpu.memory_space<vmem>>, vector<128x128xf32>,
    } else {
    }
    %c0 = arith.constant 0 : index
    %c0_1 = arith.constant 0 : index
    %3 = vector.load %arg7[%c0, %c0_1] : memref<128x128xf32, #tpu.memory_space<vmem>>, vector<128x128xf32>
    %c0_2 = arith.constant 0 : index
    %c0_3 = arith.constant 0 : index
    %4 = vector.load %arg2[%c0_2, %c0_3] : memref<128x512xf32, #tpu.memory_space<vmem>>, vector<128x512xf32>
    %c0_4 = arith.constant 0 : index
    %c0_5 = arith.constant 0 : index
    %5 = vector.load %arg3[%c0_4, %c0_5] : memref<512x128xf32, #tpu.memory_space<vmem>>, vector<512x128xf32>
    %cst = arith.constant dense<0.000000e+00> : vector<128x128xf32>
    %6 = tpu.matmul %4, %5, %cst {dimension_numbers = #tpu.dot_dimension_numbers<[1], [0], [0], [1], [0, 0, 1, 1], [], []>} : vector<128x512xf32>, vector<512x128xf32>, vector<128x128xf32> -> vector<128x128xf32>
    %7 = arith.addf %3, %6 : vector<128x128xf32>
    %c0_6 = arith.constant 0 : index
    %c0_7 = arith.constant 0 : index
    %8 = vector.load %arg7[%c0_6, %c0_7] : memref<128x128xf32, #tpu.memory_space<vmem>>, vector<128x128xf32>
    tpu.vector_store %arg7[%c0_6, %c0_7], %7 {strides = array<i32>} : memref<128x128xf32, #tpu.memory_space<vmem>>, vector<128x128xf32>,
    %c21_i32 = arith.constant 21 : i32
    %9 = arith.cmpi eq, %arg1, %c21_i32 : i32
    %10 = arith.extui %9 : i1 to i32
    %c0_i32_8 = arith.constant 0 : i32
    %11 = arith.cmpi ne, %10, %c0_i32_8 : i32
    scf.if %11 {
      %c0_9 = arith.constant 0 : index
      %c0_10 = arith.constant 0 : index
      %12 = vector.load %arg7[%c0_9, %c0_10] : memref<128x128xf32, #tpu.memory_space<vmem>>, vector<128x128xf32>
      %c0_11 = arith.constant 0 : index
      %c0_12 = arith.constant 0 : index
      %13 = vector.load %arg4[%c0_11, %c0_12] : memref<1x128xf32, #tpu.memory_space<vmem>>, vector<1x128xf32>
      %14 = vector.broadcast %13 : vector<1x128xf32> to vector<128x128xf32>
      %15 = arith.mulf %12, %14 : vector<128x128xf32>
      %c0_13 = arith.constant 0 : index
      %c0_14 = arith.constant 0 : index
      %16 = vector.load %arg5[%c0_13, %c0_14] : memref<1x128xf32, #tpu.memory_space<vmem>>, vector<1x128xf32>
      %17 = vector.broadcast %16 : vector<1x128xf32> to vector<128x128xf32>
      %18 = arith.addf %15, %17 : vector<128x128xf32>
      %cst_15 = arith.constant 0.000000e+00 : f32
      %19 = vector.broadcast %cst_15 : f32 to vector<128x128xf32>
      %20 = arith.maximumf %18, %19 : vector<128x128xf32>
      %c0_16 = arith.constant 0 : index
      %c0_17 = arith.constant 0 : index
      %21 = vector.load %arg6[%c0_16, %c0_17] : memref<128x128xf32, #tpu.memory_space<vmem>>, vector<128x128xf32>
      tpu.vector_store %arg6[%c0_16, %c0_17], %20 {strides = array<i32>} : memref<128x128xf32, #tpu.memory_space<vmem>>, vector<128x128xf32>,
    } else {
    }
    return
  }
  func.func @transform_0(%arg0: i32, %arg1: i32) -> (i32, i32) {
    %c0_i32 = arith.constant 0 : i32
    return %arg0, %arg1 : i32, i32
  }
  func.func @transform_1(%arg0: i32, %arg1: i32) -> (i32, i32) {
    %c0_i32 = arith.constant 0 : i32
    %c0_i32_0 = arith.constant 0 : i32
    return %arg1, %c0_i32 : i32, i32
  }
  func.func @transform_2(%arg0: i32, %arg1: i32) -> (i32, i32) {
    %c0_i32 = arith.constant 0 : i32
    %c0_i32_0 = arith.constant 0 : i32
    %c0_i32_1 = arith.constant 0 : i32
    return %c0_i32, %c0_i32_0 : i32, i32
  }
  func.func @transform_3(%arg0: i32, %arg1: i32) -> (i32, i32) {
    %c0_i32 = arith.constant 0 : i32
    %c0_i32_0 = arith.constant 0 : i32
    %c0_i32_1 = arith.constant 0 : i32
    return %c0_i32, %c0_i32_0 : i32, i32
  }
  func.func @transform_4(%arg0: i32, %arg1: i32) -> (i32, i32) {
    %c0_i32 = arith.constant 0 : i32
    %c0_i32_0 = arith.constant 0 : i32
    return %arg0, %c0_i32 : i32, i32
  }
}

module attributes {stable_mosaic.version = 11 : i64} {
  func.func @_mm_kernel(%arg0: i32, %arg1: i32, %arg2: memref<56x512xf32, #tpu.memory_space<vmem>>, %arg3: memref<512x64xf32, #tpu.memory_space<vmem>>, %arg4: memref<1x64xf32, #tpu.memory_space<vmem>>, %arg5: memref<1x64xf32, #tpu.memory_space<vmem>>, %arg6: memref<56x64xf32, #tpu.memory_space<vmem>>, %arg7: memref<56x64xf32, #tpu.memory_space<vmem>>) attributes {dimension_semantics = [#tpu.dimension_semantics<parallel>, #tpu.dimension_semantics<arbitrary>], iteration_bounds = array<i64: 1, 7>, scalar_prefetch = 0 : i64, scratch_operands = 1 : i64, tpu.core_type = #tpu.core_type<tc>, window_params = [{transform_indices = @transform_0, window_bounds = array<i64: 56, 512>}, {transform_indices = @transform_1, window_bounds = array<i64: 512, 64>}, {pipeline_mode = #tpu.pipeline_mode<synchronous>, transform_indices = @transform_2, window_bounds = array<i64: 1, 64>}, {pipeline_mode = #tpu.pipeline_mode<synchronous>, transform_indices = @transform_3, window_bounds = array<i64: 1, 64>}, {transform_indices = @transform_4, window_bounds = array<i64: 56, 64>}]} {
    %c0_i32 = arith.constant 0 : i32
    %0 = arith.cmpi eq, %arg1, %c0_i32 : i32
    %1 = arith.extui %0 : i1 to i32
    %c0_i32_0 = arith.constant 0 : i32
    %2 = arith.cmpi ne, %1, %c0_i32_0 : i32
    scf.if %2 {
      %cst_9 = arith.constant 0.000000e+00 : f32
      %12 = vector.broadcast %cst_9 : f32 to vector<56x64xf32>
      %c0_10 = arith.constant 0 : index
      %c0_11 = arith.constant 0 : index
      %13 = vector.load %arg7[%c0_10, %c0_11] : memref<56x64xf32, #tpu.memory_space<vmem>>, vector<56x64xf32>
      tpu.vector_store %arg7[%c0_10, %c0_11], %12 {strides = array<i32>} : memref<56x64xf32, #tpu.memory_space<vmem>>, vector<56x64xf32>,
    } else {
    }
    %c0 = arith.constant 0 : index
    %c0_1 = arith.constant 0 : index
    %3 = vector.load %arg7[%c0, %c0_1] : memref<56x64xf32, #tpu.memory_space<vmem>>, vector<56x64xf32>
    %c0_2 = arith.constant 0 : index
    %c0_3 = arith.constant 0 : index
    %4 = vector.load %arg2[%c0_2, %c0_3] : memref<56x512xf32, #tpu.memory_space<vmem>>, vector<56x512xf32>
    %c0_4 = arith.constant 0 : index
    %c0_5 = arith.constant 0 : index
    %5 = vector.load %arg3[%c0_4, %c0_5] : memref<512x64xf32, #tpu.memory_space<vmem>>, vector<512x64xf32>
    %cst = arith.constant dense<0.000000e+00> : vector<56x64xf32>
    %6 = tpu.matmul %4, %5, %cst {dimension_numbers = #tpu.dot_dimension_numbers<[1], [0], [0], [1], [0, 0, 1, 1], [], []>} : vector<56x512xf32>, vector<512x64xf32>, vector<56x64xf32> -> vector<56x64xf32>
    %7 = arith.addf %3, %6 : vector<56x64xf32>
    %c0_6 = arith.constant 0 : index
    %c0_7 = arith.constant 0 : index
    %8 = vector.load %arg7[%c0_6, %c0_7] : memref<56x64xf32, #tpu.memory_space<vmem>>, vector<56x64xf32>
    tpu.vector_store %arg7[%c0_6, %c0_7], %7 {strides = array<i32>} : memref<56x64xf32, #tpu.memory_space<vmem>>, vector<56x64xf32>,
    %c6_i32 = arith.constant 6 : i32
    %9 = arith.cmpi eq, %arg1, %c6_i32 : i32
    %10 = arith.extui %9 : i1 to i32
    %c0_i32_8 = arith.constant 0 : i32
    %11 = arith.cmpi ne, %10, %c0_i32_8 : i32
    scf.if %11 {
      %c0_9 = arith.constant 0 : index
      %c0_10 = arith.constant 0 : index
      %12 = vector.load %arg7[%c0_9, %c0_10] : memref<56x64xf32, #tpu.memory_space<vmem>>, vector<56x64xf32>
      %c0_11 = arith.constant 0 : index
      %c0_12 = arith.constant 0 : index
      %13 = vector.load %arg4[%c0_11, %c0_12] : memref<1x64xf32, #tpu.memory_space<vmem>>, vector<1x64xf32>
      %14 = vector.broadcast %13 : vector<1x64xf32> to vector<56x64xf32>
      %15 = arith.mulf %12, %14 : vector<56x64xf32>
      %c0_13 = arith.constant 0 : index
      %c0_14 = arith.constant 0 : index
      %16 = vector.load %arg5[%c0_13, %c0_14] : memref<1x64xf32, #tpu.memory_space<vmem>>, vector<1x64xf32>
      %17 = vector.broadcast %16 : vector<1x64xf32> to vector<56x64xf32>
      %18 = arith.addf %15, %17 : vector<56x64xf32>
      %cst_15 = arith.constant 0.000000e+00 : f32
      %19 = vector.broadcast %cst_15 : f32 to vector<56x64xf32>
      %20 = arith.maximumf %18, %19 : vector<56x64xf32>
      %c0_16 = arith.constant 0 : index
      %c0_17 = arith.constant 0 : index
      %21 = vector.load %arg6[%c0_16, %c0_17] : memref<56x64xf32, #tpu.memory_space<vmem>>, vector<56x64xf32>
      tpu.vector_store %arg6[%c0_16, %c0_17], %20 {strides = array<i32>} : memref<56x64xf32, #tpu.memory_space<vmem>>, vector<56x64xf32>,
    } else {
    }
    return
  }
  func.func @transform_0(%arg0: i32, %arg1: i32) -> (i32, i32) {
    %c0_i32 = arith.constant 0 : i32
    return %arg0, %arg1 : i32, i32
  }
  func.func @transform_1(%arg0: i32, %arg1: i32) -> (i32, i32) {
    %c0_i32 = arith.constant 0 : i32
    %c0_i32_0 = arith.constant 0 : i32
    return %arg1, %c0_i32 : i32, i32
  }
  func.func @transform_2(%arg0: i32, %arg1: i32) -> (i32, i32) {
    %c0_i32 = arith.constant 0 : i32
    %c0_i32_0 = arith.constant 0 : i32
    %c0_i32_1 = arith.constant 0 : i32
    return %c0_i32, %c0_i32_0 : i32, i32
  }
  func.func @transform_3(%arg0: i32, %arg1: i32) -> (i32, i32) {
    %c0_i32 = arith.constant 0 : i32
    %c0_i32_0 = arith.constant 0 : i32
    %c0_i32_1 = arith.constant 0 : i32
    return %c0_i32, %c0_i32_0 : i32, i32
  }
  func.func @transform_4(%arg0: i32, %arg1: i32) -> (i32, i32) {
    %c0_i32 = arith.constant 0 : i32
    %c0_i32_0 = arith.constant 0 : i32
    return %arg0, %c0_i32 : i32, i32
  }
}

module attributes {stable_mosaic.version = 11 : i64} {
  func.func @_mm_kernel(%arg0: i32, %arg1: i32, %arg2: memref<8x512xf32, #tpu.memory_space<vmem>>, %arg3: memref<512x6xf32, #tpu.memory_space<vmem>>, %arg4: memref<1x6xf32, #tpu.memory_space<vmem>>, %arg5: memref<1x6xf32, #tpu.memory_space<vmem>>, %arg6: memref<8x6xf32, #tpu.memory_space<vmem>>, %arg7: memref<8x6xf32, #tpu.memory_space<vmem>>) attributes {dimension_semantics = [#tpu.dimension_semantics<parallel>, #tpu.dimension_semantics<arbitrary>], iteration_bounds = array<i64: 1, 4>, scalar_prefetch = 0 : i64, scratch_operands = 1 : i64, tpu.core_type = #tpu.core_type<tc>, window_params = [{transform_indices = @transform_0, window_bounds = array<i64: 8, 512>}, {transform_indices = @transform_1, window_bounds = array<i64: 512, 6>}, {pipeline_mode = #tpu.pipeline_mode<synchronous>, transform_indices = @transform_2, window_bounds = array<i64: 1, 6>}, {pipeline_mode = #tpu.pipeline_mode<synchronous>, transform_indices = @transform_3, window_bounds = array<i64: 1, 6>}, {transform_indices = @transform_4, window_bounds = array<i64: 8, 6>}]} {
    %c0_i32 = arith.constant 0 : i32
    %0 = arith.cmpi eq, %arg1, %c0_i32 : i32
    %1 = arith.extui %0 : i1 to i32
    %c0_i32_0 = arith.constant 0 : i32
    %2 = arith.cmpi ne, %1, %c0_i32_0 : i32
    scf.if %2 {
      %cst_9 = arith.constant 0.000000e+00 : f32
      %12 = vector.broadcast %cst_9 : f32 to vector<8x6xf32>
      %c0_10 = arith.constant 0 : index
      %c0_11 = arith.constant 0 : index
      %13 = vector.load %arg7[%c0_10, %c0_11] : memref<8x6xf32, #tpu.memory_space<vmem>>, vector<8x6xf32>
      tpu.vector_store %arg7[%c0_10, %c0_11], %12 {strides = array<i32>} : memref<8x6xf32, #tpu.memory_space<vmem>>, vector<8x6xf32>,
    } else {
    }
    %c0 = arith.constant 0 : index
    %c0_1 = arith.constant 0 : index
    %3 = vector.load %arg7[%c0, %c0_1] : memref<8x6xf32, #tpu.memory_space<vmem>>, vector<8x6xf32>
    %c0_2 = arith.constant 0 : index
    %c0_3 = arith.constant 0 : index
    %4 = vector.load %arg2[%c0_2, %c0_3] : memref<8x512xf32, #tpu.memory_space<vmem>>, vector<8x512xf32>
    %c0_4 = arith.constant 0 : index
    %c0_5 = arith.constant 0 : index
    %5 = vector.load %arg3[%c0_4, %c0_5] : memref<512x6xf32, #tpu.memory_space<vmem>>, vector<512x6xf32>
    %cst = arith.constant dense<0.000000e+00> : vector<8x6xf32>
    %6 = tpu.matmul %4, %5, %cst {dimension_numbers = #tpu.dot_dimension_numbers<[1], [0], [0], [1], [0, 0, 1, 1], [], []>} : vector<8x512xf32>, vector<512x6xf32>, vector<8x6xf32> -> vector<8x6xf32>
    %7 = arith.addf %3, %6 : vector<8x6xf32>
    %c0_6 = arith.constant 0 : index
    %c0_7 = arith.constant 0 : index
    %8 = vector.load %arg7[%c0_6, %c0_7] : memref<8x6xf32, #tpu.memory_space<vmem>>, vector<8x6xf32>
    tpu.vector_store %arg7[%c0_6, %c0_7], %7 {strides = array<i32>} : memref<8x6xf32, #tpu.memory_space<vmem>>, vector<8x6xf32>,
    %c3_i32 = arith.constant 3 : i32
    %9 = arith.cmpi eq, %arg1, %c3_i32 : i32
    %10 = arith.extui %9 : i1 to i32
    %c0_i32_8 = arith.constant 0 : i32
    %11 = arith.cmpi ne, %10, %c0_i32_8 : i32
    scf.if %11 {
      %c0_9 = arith.constant 0 : index
      %c0_10 = arith.constant 0 : index
      %12 = vector.load %arg7[%c0_9, %c0_10] : memref<8x6xf32, #tpu.memory_space<vmem>>, vector<8x6xf32>
      %c0_11 = arith.constant 0 : index
      %c0_12 = arith.constant 0 : index
      %13 = vector.load %arg4[%c0_11, %c0_12] : memref<1x6xf32, #tpu.memory_space<vmem>>, vector<1x6xf32>
      %14 = vector.broadcast %13 : vector<1x6xf32> to vector<8x6xf32>
      %15 = arith.mulf %12, %14 : vector<8x6xf32>
      %c0_13 = arith.constant 0 : index
      %c0_14 = arith.constant 0 : index
      %16 = vector.load %arg5[%c0_13, %c0_14] : memref<1x6xf32, #tpu.memory_space<vmem>>, vector<1x6xf32>
      %17 = vector.broadcast %16 : vector<1x6xf32> to vector<8x6xf32>
      %18 = arith.addf %15, %17 : vector<8x6xf32>
      %c0_15 = arith.constant 0 : index
      %c0_16 = arith.constant 0 : index
      %19 = vector.load %arg6[%c0_15, %c0_16] : memref<8x6xf32, #tpu.memory_space<vmem>>, vector<8x6xf32>
      tpu.vector_store %arg6[%c0_15, %c0_16], %18 {strides = array<i32>} : memref<8x6xf32, #tpu.memory_space<vmem>>, vector<8x6xf32>,
    } else {
    }
    return
  }
  func.func @transform_0(%arg0: i32, %arg1: i32) -> (i32, i32) {
    %c0_i32 = arith.constant 0 : i32
    return %arg0, %arg1 : i32, i32
  }
  func.func @transform_1(%arg0: i32, %arg1: i32) -> (i32, i32) {
    %c0_i32 = arith.constant 0 : i32
    %c0_i32_0 = arith.constant 0 : i32
    return %arg1, %c0_i32 : i32, i32
  }
  func.func @transform_2(%arg0: i32, %arg1: i32) -> (i32, i32) {
    %c0_i32 = arith.constant 0 : i32
    %c0_i32_0 = arith.constant 0 : i32
    %c0_i32_1 = arith.constant 0 : i32
    return %c0_i32, %c0_i32_0 : i32, i32
  }
  func.func @transform_3(%arg0: i32, %arg1: i32) -> (i32, i32) {
    %c0_i32 = arith.constant 0 : i32
    %c0_i32_0 = arith.constant 0 : i32
    %c0_i32_1 = arith.constant 0 : i32
    return %c0_i32, %c0_i32_0 : i32, i32
  }
  func.func @transform_4(%arg0: i32, %arg1: i32) -> (i32, i32) {
    %c0_i32 = arith.constant 0 : i32
    %c0_i32_0 = arith.constant 0 : i32
    return %arg0, %c0_i32 : i32, i32
  }
}

</mosaic_0001>

<bundles_post_ra>
// kernel: feature_regression_forward.3
= control target key start
LH: loop header
LB: loop body
LE: loop exit
PB: predicated region body
PF: predicated region fallthrough
CT: control target
= control target key end

     0   :  { %s1380_s15 = smov 0   ;;  %s1382_s16 = smov 0   ;;  %s1780_s0 = inlined_call_operand.vmem [shape: f32[256,11264], index: 0, kind: input, shape index: {}]   ;;  %s1781_s1 = inlined_call_operand.vmem [shape: f32[11264,128], index: 1, kind: input, shape index: {}]   ;;  %s1782_s2 = inlined_call_operand.vmem [shape: f32[1,128], index: 2, kind: input, shape index: {}]   ;;  %s1783_s3 = inlined_call_operand.vmem [shape: f32[1,128], index: 3, kind: input, shape index: {}]   ;;  %s1784_s4 = inlined_call_operand.vmem [shape: f32[256,128], index: 4, kind: output, shape index: {}]  }
   0x1   :  { %s1384_s17 = smov 0   ;;  %s1386_s18 = smov 0  }
   0x2   :  { %s1388_s19 = smov 0   ;;  %s1390_s20 = smov 0  }
   0x3   :  { %s1392_s21 = smov 0  }
   0x4 LB: > { %s23_s22 = sadd.s32 1, %s1344_s19  ;;  %s26_s23 = sadd.s32 1, %s1348_s20  ;;  %s1352_s21 = sphi %s1392_s21, %s14_s21   ;;  %s1348_s20 = sphi %s1390_s20, %s1790_s20   ;;  %s1344_s19 = sphi %s1388_s19, %s1789_s19   ;;  %s1340_s18 = sphi %s1386_s18, %s1788_s18   ;;  %s1336_s17 = sphi %s1384_s17, %s1787_s17   ;;  %s1332_s16 = sphi %s1382_s16, %s1786_s16   ;;  %s1328_s15 = sphi %s1380_s15, %s1785_s15  }
   0x5   : > { %p24_p0 = scmp.ge.s32.totalorder %s23_s22, 22  ;;  %p42_p1 = scmp.ne.s32.totalorder %s1332_s16, %s1328_s15 }
   0x6   : > { %p43_p2 = scmp.eq.s32.totalorder %s1352_s21, 0  ;;  %s35_s27 = sadd.s32 1, %s1332_s16 }
   0x7   : > { %s1792_s22 = smov (%p24_p0, %s23_s22), 0  ;;  %s1794_s23 = smov (!%p24_p0, %s26_s23), %s1348_s20 }
   0x8   : > { %p44_p3 = por %p43_p2, %p42_p1  ;;  %p28_p4 = scmp.ge.s32.totalorder %s1794_s23, 2 }
   0x9   : > { %s31_s24 = ssub.s32 %s1344_s19, %s1792_s22  ;;  %p1062_p6 = scmp.ge.s32.totalorder %s1352_s21, 44 }
   0xa   : > { %s1796_s23 = smov (%p28_p4, %s1794_s23), 0 }
   0xb   : > { %s30_s25 = ssub.s32 %s1348_s20, %s1796_s23  ;;  %168 = sbr.rel (%p1062_p6) target bundleno = 56 (0x38), region = 24 }
   0xc   : > { %s32_s26 = sor.u32 %s31_s24, %s30_s25 }
   0xd   : > { %p33_p5 = scmp.eq.s32.totalorder %s32_s26, 0 }
   0xf   : > { %s1431_s28 = scalar_select %p33_p5, %s1332_s16, %s35_s27  }
  0x10   : > { %171 = sbr.rel (!%p44_p3) target bundleno = 56 (0x38), region = 28  ;;  %s173_s29 = sand.u32 (%p44_p3), 1, %s1332_s16  }
  0x11   : > { %s1065_s30 = sshll.u32 (%p44_p3), %s1344_s19, 2  ;;  %s1063_s5 = sshll.u32 (%p44_p3), %s173_s29, 9 }
  0x12   : > { %s1240_s6 = smul.u32 (%p44_p3), 1408, %s1348_s20  ;;  %s1445_s12 = scalar_lea.vmem (%p44_p3), [#allocation3], %s1063_s5 }
  0x14   : > { %s179_s7 = sadd.s32 (%p44_p3), %s1240_s6, %s1065_s30 }
  0x15   : > { %s1067_s8 = sshll.u32 %s179_s7, 3 }
  0x16   : > { %s1440_s11 = scalar_lea.vmem %s1780_s0, %s1067_s8 }
  0x17   : > { %v194_v0 = vld [vmem:[%s1440_s11] sm:$0xff]  ;;  %v196_v1 = vld [vmem:[%s1440_s11 + $0x8] sm:$0xff]  ;;  %v198_v2 = vld [vmem:[%s1440_s11 + $0x10] sm:$0xff] }
  0x18   : > { %195 = vst [vmem:[%s1445_s12] sm:$0xff] %v194_v0  ;;  %197 = vst [vmem:[%s1445_s12 + $0x8] sm:$0xff] %v196_v1  ;;  %v200_v3 = vld [vmem:[%s1440_s11 + $0x18] sm:$0xff]  ;;  %v202_v4 = vld [vmem:[%s1440_s11 + $0x2c0] sm:$0xff] }
  0x19   : > { %199 = vst [vmem:[%s1445_s12 + $0x10] sm:$0xff] %v198_v2  ;;  %v204_v5 = vld [vmem:[%s1440_s11 + $0x2c8] sm:$0xff]  ;;  %201 = vst [vmem:[%s1445_s12 + $0x18] sm:$0xff] %v200_v3  ;;  %v206_v6 = vld [vmem:[%s1440_s11 + $0x2d0] sm:$0xff] }
  0x1a   : > { %203 = vst [vmem:[%s1445_s12 + $0x20] sm:$0xff] %v202_v4  ;;  %205 = vst [vmem:[%s1445_s12 + $0x28] sm:$0xff] %v204_v5  ;;  %v208_v7 = vld [vmem:[%s1440_s11 + $0x2d8] sm:$0xff]  ;;  %v210_v8 = vld [vmem:[%s1440_s11 + $0x580] sm:$0xff] }
  0x1b   : > { %207 = vst [vmem:[%s1445_s12 + $0x30] sm:$0xff] %v206_v6  ;;  %209 = vst [vmem:[%s1445_s12 + $0x38] sm:$0xff] %v208_v7  ;;  %v212_v9 = vld [vmem:[%s1440_s11 + $0x588] sm:$0xff]  ;;  %v214_v10 = vld [vmem:[%s1440_s11 + $0x590] sm:$0xff] }
  0x1c   : > { %211 = vst [vmem:[%s1445_s12 + $0x40] sm:$0xff] %v210_v8  ;;  %v216_v11 = vld [vmem:[%s1440_s11 + $0x598] sm:$0xff]  ;;  %213 = vst [vmem:[%s1445_s12 + $0x48] sm:$0xff] %v212_v9  ;;  %v218_v12 = vld [vmem:[%s1440_s11 + $0x840] sm:$0xff] }
  0x1d   : > { %215 = vst [vmem:[%s1445_s12 + $0x50] sm:$0xff] %v214_v10  ;;  %217 = vst [vmem:[%s1445_s12 + $0x58] sm:$0xff] %v216_v11  ;;  %v220_v13 = vld [vmem:[%s1440_s11 + $0x848] sm:$0xff]  ;;  %v222_v14 = vld [vmem:[%s1440_s11 + $0x850] sm:$0xff] }
  0x1e   : > { %219 = vst [vmem:[%s1445_s12 + $0x60] sm:$0xff] %v218_v12  ;;  %221 = vst [vmem:[%s1445_s12 + $0x68] sm:$0xff] %v220_v13  ;;  %v224_v15 = vld [vmem:[%s1440_s11 + $0x858] sm:$0xff]  ;;  %v226_v16 = vld [vmem:[%s1440_s11 + $0xb00] sm:$0xff] }
  0x1f   : > { %223 = vst [vmem:[%s1445_s12 + $0x70] sm:$0xff] %v222_v14  ;;  %v228_v17 = vld [vmem:[%s1440_s11 + $0xb08] sm:$0xff]  ;;  %225 = vst [vmem:[%s1445_s12 + $0x78] sm:$0xff] %v224_v15  ;;  %v230_v18 = vld [vmem:[%s1440_s11 + $0xb10] sm:$0xff] }
  0x20   : > { %227 = vst [vmem:[%s1445_s12 + $0x80] sm:$0xff] %v226_v16  ;;  %229 = vst [vmem:[%s1445_s12 + $0x88] sm:$0xff] %v228_v17  ;;  %v232_v19 = vld [vmem:[%s1440_s11 + $0xb18] sm:$0xff]  ;;  %v234_v20 = vld [vmem:[%s1440_s11 + $0xdc0] sm:$0xff] }
  0x21   : > { %231 = vst [vmem:[%s1445_s12 + $0x90] sm:$0xff] %v230_v18  ;;  %233 = vst [vmem:[%s1445_s12 + $0x98] sm:$0xff] %v232_v19  ;;  %v236_v21 = vld [vmem:[%s1440_s11 + $0xdc8] sm:$0xff]  ;;  %v238_v22 = vld [vmem:[%s1440_s11 + $0xdd0] sm:$0xff] }
  0x22   : > { %235 = vst [vmem:[%s1445_s12 + $0xa0] sm:$0xff] %v234_v20  ;;  %v240_v23 = vld [vmem:[%s1440_s11 + $0xdd8] sm:$0xff]  ;;  %237 = vst [vmem:[%s1445_s12 + $0xa8] sm:$0xff] %v236_v21  ;;  %v242_v24 = vld [vmem:[%s1440_s11 + $0x1080] sm:$0xff] }
  0x23   : > { %239 = vst [vmem:[%s1445_s12 + $0xb0] sm:$0xff] %v238_v22  ;;  %241 = vst [vmem:[%s1445_s12 + $0xb8] sm:$0xff] %v240_v23  ;;  %v244_v25 = vld [vmem:[%s1440_s11 + $0x1088] sm:$0xff]  ;;  %v246_v26 = vld [vmem:[%s1440_s11 + $0x1090] sm:$0xff] }
  0x24   : > { %243 = vst [vmem:[%s1445_s12 + $0xc0] sm:$0xff] %v242_v24  ;;  %245 = vst [vmem:[%s1445_s12 + $0xc8] sm:$0xff] %v244_v25  ;;  %v248_v27 = vld [vmem:[%s1440_s11 + $0x1098] sm:$0xff]  ;;  %v250_v28 = vld [vmem:[%s1440_s11 + $0x1340] sm:$0xff] }
  0x25   : > { %247 = vst [vmem:[%s1445_s12 + $0xd0] sm:$0xff] %v246_v26  ;;  %v252_v29 = vld [vmem:[%s1440_s11 + $0x1348] sm:$0xff]  ;;  %249 = vst [vmem:[%s1445_s12 + $0xd8] sm:$0xff] %v248_v27  ;;  %v254_v30 = vld [vmem:[%s1440_s11 + $0x1350] sm:$0xff] }
  0x26   : > { %251 = vst [vmem:[%s1445_s12 + $0xe0] sm:$0xff] %v250_v28  ;;  %253 = vst [vmem:[%s1445_s12 + $0xe8] sm:$0xff] %v252_v29  ;;  %v256_v31 = vld [vmem:[%s1440_s11 + $0x1358] sm:$0xff]  ;;  %v258_v32 = vld [vmem:[%s1440_s11 + $0x1600] sm:$0xff] }
  0x27   : > { %255 = vst [vmem:[%s1445_s12 + $0xf0] sm:$0xff] %v254_v30  ;;  %257 = vst [vmem:[%s1445_s12 + $0xf8] sm:$0xff] %v256_v31  ;;  %v260_v33 = vld [vmem:[%s1440_s11 + $0x1608] sm:$0xff]  ;;  %v262_v34 = vld [vmem:[%s1440_s11 + $0x1610] sm:$0xff] }
  0x28   : > { %259 = vst [vmem:[%s1445_s12 + $0x100] sm:$0xff] %v258_v32  ;;  %v264_v35 = vld [vmem:[%s1440_s11 + $0x1618] sm:$0xff]  ;;  %261 = vst [vmem:[%s1445_s12 + $0x108] sm:$0xff] %v260_v33  ;;  %v266_v36 = vld [vmem:[%s1440_s11 + $0x18c0] sm:$0xff] }
  0x29   : > { %263 = vst [vmem:[%s1445_s12 + $0x110] sm:$0xff] %v262_v34  ;;  %265 = vst [vmem:[%s1445_s12 + $0x118] sm:$0xff] %v264_v35  ;;  %v268_v37 = vld [vmem:[%s1440_s11 + $0x18c8] sm:$0xff]  ;;  %v270_v38 = vld [vmem:[%s1440_s11 + $0x18d0] sm:$0xff] }
  0x2a   : > { %267 = vst [vmem:[%s1445_s12 + $0x120] sm:$0xff] %v266_v36  ;;  %269 = vst [vmem:[%s1445_s12 + $0x128] sm:$0xff] %v268_v37  ;;  %v272_v39 = vld [vmem:[%s1440_s11 + $0x18d8] sm:$0xff]  ;;  %v274_v40 = vld [vmem:[%s1440_s11 + $0x1b80] sm:$0xff] }
  0x2b   : > { %271 = vst [vmem:[%s1445_s12 + $0x130] sm:$0xff] %v270_v38  ;;  %v276_v41 = vld [vmem:[%s1440_s11 + $0x1b88] sm:$0xff]  ;;  %273 = vst [vmem:[%s1445_s12 + $0x138] sm:$0xff] %v272_v39  ;;  %v278_v42 = vld [vmem:[%s1440_s11 + $0x1b90] sm:$0xff] }
  0x2c   : > { %275 = vst [vmem:[%s1445_s12 + $0x140] sm:$0xff] %v274_v40  ;;  %277 = vst [vmem:[%s1445_s12 + $0x148] sm:$0xff] %v276_v41  ;;  %v280_v43 = vld [vmem:[%s1440_s11 + $0x1b98] sm:$0xff]  ;;  %v282_v44 = vld [vmem:[%s1440_s11 + $0x1e40] sm:$0xff] }
  0x2d   : > { %279 = vst [vmem:[%s1445_s12 + $0x150] sm:$0xff] %v278_v42  ;;  %281 = vst [vmem:[%s1445_s12 + $0x158] sm:$0xff] %v280_v43  ;;  %v284_v45 = vld [vmem:[%s1440_s11 + $0x1e48] sm:$0xff]  ;;  %v286_v46 = vld [vmem:[%s1440_s11 + $0x1e50] sm:$0xff] }
  0x2e   : > { %283 = vst [vmem:[%s1445_s12 + $0x160] sm:$0xff] %v282_v44  ;;  %v288_v47 = vld [vmem:[%s1440_s11 + $0x1e58] sm:$0xff]  ;;  %285 = vst [vmem:[%s1445_s12 + $0x168] sm:$0xff] %v284_v45  ;;  %v290_v48 = vld [vmem:[%s1440_s11 + $0x2100] sm:$0xff] }
  0x2f   : > { %287 = vst [vmem:[%s1445_s12 + $0x170] sm:$0xff] %v286_v46  ;;  %289 = vst [vmem:[%s1445_s12 + $0x178] sm:$0xff] %v288_v47  ;;  %v292_v49 = vld [vmem:[%s1440_s11 + $0x2108] sm:$0xff]  ;;  %v294_v50 = vld [vmem:[%s1440_s11 + $0x2110] sm:$0xff] }
  0x30   : > { %291 = vst [vmem:[%s1445_s12 + $0x180] sm:$0xff] %v290_v48  ;;  %293 = vst [vmem:[%s1445_s12 + $0x188] sm:$0xff] %v292_v49  ;;  %v296_v51 = vld [vmem:[%s1440_s11 + $0x2118] sm:$0xff]  ;;  %v298_v52 = vld [vmem:[%s1440_s11 + $0x23c0] sm:$0xff] }
  0x31   : > { %295 = vst [vmem:[%s1445_s12 + $0x190] sm:$0xff] %v294_v50  ;;  %v300_v53 = vld [vmem:[%s1440_s11 + $0x23c8] sm:$0xff]  ;;  %297 = vst [vmem:[%s1445_s12 + $0x198] sm:$0xff] %v296_v51  ;;  %v302_v54 = vld [vmem:[%s1440_s11 + $0x23d0] sm:$0xff] }
  0x32   : > { %299 = vst [vmem:[%s1445_s12 + $0x1a0] sm:$0xff] %v298_v52  ;;  %301 = vst [vmem:[%s1445_s12 + $0x1a8] sm:$0xff] %v300_v53  ;;  %v304_v55 = vld [vmem:[%s1440_s11 + $0x23d8] sm:$0xff]  ;;  %v306_v56 = vld [vmem:[%s1440_s11 + $0x2680] sm:$0xff] }
  0x33   : > { %303 = vst [vmem:[%s1445_s12 + $0x1b0] sm:$0xff] %v302_v54  ;;  %305 = vst [vmem:[%s1445_s12 + $0x1b8] sm:$0xff] %v304_v55  ;;  %v308_v57 = vld [vmem:[%s1440_s11 + $0x2688] sm:$0xff]  ;;  %v310_v58 = vld [vmem:[%s1440_s11 + $0x2690] sm:$0xff] }
  0x34   : > { %307 = vst [vmem:[%s1445_s12 + $0x1c0] sm:$0xff] %v306_v56  ;;  %v312_v59 = vld [vmem:[%s1440_s11 + $0x2698] sm:$0xff]  ;;  %309 = vst [vmem:[%s1445_s12 + $0x1c8] sm:$0xff] %v308_v57  ;;  %v314_v60 = vld [vmem:[%s1440_s11 + $0x2940] sm:$0xff] }
  0x35   : > { %311 = vst [vmem:[%s1445_s12 + $0x1d0] sm:$0xff] %v310_v58  ;;  %313 = vst [vmem:[%s1445_s12 + $0x1d8] sm:$0xff] %v312_v59  ;;  %v316_v61 = vld [vmem:[%s1440_s11 + $0x2948] sm:$0xff]  ;;  %v318_v62 = vld [vmem:[%s1440_s11 + $0x2950] sm:$0xff] }
  0x36   : > { %315 = vst [vmem:[%s1445_s12 + $0x1e0] sm:$0xff] %v314_v60  ;;  %317 = vst [vmem:[%s1445_s12 + $0x1e8] sm:$0xff] %v316_v61  ;;  %v320_v63 = vld [vmem:[%s1440_s11 + $0x2958] sm:$0xff] }
  0x37   : > { %319 = vst [vmem:[%s1445_s12 + $0x1f0] sm:$0xff] %v318_v62  ;;  %321 = vst [vmem:[%s1445_s12 + $0x1f8] sm:$0xff] %v320_v63 }
  0x38 PF: > { %p1068_p7 = scmp.ge.s32.totalorder %s1352_s21, 1  ;;  %p335_p8 = scmp.lt.s32.totalorder %s1352_s21, 45 }
  0x3a   : > { %p336_p9 = pnand %p1068_p7, %p335_p8 }
  0x3b   : > { %s342_s13 = sand.u32 (!%p336_p9), 1, %s1328_s15   ;;  %s1070_s14 = sshll.u32 (!%p336_p9), %s1336_s17, 6 }
  0x3c   : > { %339 = sbr.rel (%p336_p9) target bundleno = 398 (0x18e), region = 55  ;;  %s1069_s24 = sshll.u32 (!%p336_p9), %s342_s13, 9 }
  0x3d   : > { %p375_p10 = scmp.lt.s32.totalorder (!%p336_p9), %s1070_s14, 1407  ;;  %s1072_s25 = sshll.u32 (!%p336_p9), %s1340_s18, 4 }
  0x3e   : > { %p381_p11 = scmp.lt.s32.totalorder (!%p336_p9), %s1072_s25, 31  ;;  %s1587_s15 = scalar_lea.vmem (!%p336_p9), [#allocation3], %s1069_s24 }
  0x3f   : > { %p1074_p12 = scmp.ne.s32.totalorder (!%p336_p9), %s1336_s17, 0 }
  0x41   : > { %s1798_s14 = smov (!%p375_p10, %s1070_s14), 1407  ;;  %s1800_s25 = smov (!%p381_p11, %s1072_s25), 31 }
  0x42   : > { %s1071_s26 = sshll.u32 %s1798_s14, 3  ;;  %s1073_s5 = sshll.u32 %s1800_s25, 3 }
  0x43   : > { %s1580_s30 = scalar_lea.vmem %s1781_s1, %s1071_s26  ;;  %s1585_s8 = scalar_lea.vmem %s1784_s4, %s1073_s5 }
  0x44   : > { %389 = sbr.rel (%p1074_p12) target bundleno = 82 (0x52), region = 63 }
  0x49   : > { %v1354_v0 = vmov 0.0  }
  0x4a   : > { %390 = vst [vmem:[#allocation2 + $0x30] sm:$0xff] %v1354_v0  ;;  %391 = vst [vmem:[#allocation2] sm:$0xff] %v1354_v0 }
  0x4b   : > { %392 = vst [vmem:[#allocation2 + $0x58] sm:$0xff] %v1354_v0  ;;  %393 = vst [vmem:[#allocation2 + $0x18] sm:$0xff] %v1354_v0 }
  0x4c   : > { %394 = vst [vmem:[#allocation2 + $0x50] sm:$0xff] %v1354_v0  ;;  %395 = vst [vmem:[#allocation2 + $0x68] sm:$0xff] %v1354_v0 }
  0x4d   : > { %396 = vst [vmem:[#allocation2 + $0x8] sm:$0xff] %v1354_v0  ;;  %397 = vst [vmem:[#allocation2 + $0x48] sm:$0xff] %v1354_v0 }
  0x4e   : > { %398 = vst [vmem:[#allocation2 + $0x40] sm:$0xff] %v1354_v0  ;;  %399 = vst [vmem:[#allocation2 + $0x20] sm:$0xff] %v1354_v0 }
  0x4f   : > { %400 = vst [vmem:[#allocation2 + $0x10] sm:$0xff] %v1354_v0  ;;  %401 = vst [vmem:[#allocation2 + $0x38] sm:$0xff] %v1354_v0 }
  0x50   : > { %402 = vst [vmem:[#allocation2 + $0x60] sm:$0xff] %v1354_v0  ;;  %403 = vst [vmem:[#allocation2 + $0x70] sm:$0xff] %v1354_v0 }
  0x51   : > { %404 = vst [vmem:[#allocation2 + $0x78] sm:$0xff] %v1354_v0  ;;  %405 = vst [vmem:[#allocation2 + $0x28] sm:$0xff] %v1354_v0 }
  0x52 PF: > { %v517_v1 = vld [vmem:[%s1580_s30 + $0xf8] sm:$0xff]  ;;  %v516_v5 = vld [vmem:[%s1580_s30 + $0xf0] sm:$0xff]  ;;  %v515_v9 = vld [vmem:[%s1580_s30 + $0xe8] sm:$0xff]  ;;  %p1075_p13 = scmp.ne.s32.totalorder %s1336_s17, 21 }
  0x53   : > { %v549_v2 = vld [vmem:[%s1580_s30 + $0x1f8] sm:$0xff]  ;;  %1080 = vmatprep.subr.mxu0 %v517_v1  ;;  %v548_v6 = vld [vmem:[%s1580_s30 + $0x1f0] sm:$0xff]  ;;  %v547_v10 = vld [vmem:[%s1580_s30 + $0x1e8] sm:$0xff] }
  0x54   : > { %v501_v3 = vld [vmem:[%s1580_s30 + $0x78] sm:$0xff]  ;;  %1160 = vmatprep.subr.mxu1 %v549_v2  ;;  %v500_v7 = vld [vmem:[%s1580_s30 + $0x70] sm:$0xff]  ;;  %v499_v11 = vld [vmem:[%s1580_s30 + $0x68] sm:$0xff] }
  0x55   : > { %v533_v4 = vld [vmem:[%s1580_s30 + $0x178] sm:$0xff]  ;;  %1081 = vmatpush3.msra.mxu0 %v501_v3  ;;  %v532_v8 = vld [vmem:[%s1580_s30 + $0x170] sm:$0xff]  ;;  %v531_v12 = vld [vmem:[%s1580_s30 + $0x168] sm:$0xff] }
  0x56   : > { %1161 = vmatpush3.msra.mxu1 %v533_v4  ;;  %1082 = vmatprep.subr.mxu0 %v516_v5  ;;  %v514_v13 = vld [vmem:[%s1580_s30 + $0xe0] sm:$0xff]  ;;  %v513_v17 = vld [vmem:[%s1580_s30 + $0xd8] sm:$0xff]  ;;  %v512_v21 = vld [vmem:[%s1580_s30 + $0xd0] sm:$0xff] }
  0x57   : > { %1162 = vmatprep.subr.mxu1 %v548_v6  ;;  %1083 = vmatpush3.msra.mxu0 %v500_v7  ;;  %v546_v14 = vld [vmem:[%s1580_s30 + $0x1e0] sm:$0xff]  ;;  %v545_v18 = vld [vmem:[%s1580_s30 + $0x1d8] sm:$0xff]  ;;  %v544_v22 = vld [vmem:[%s1580_s30 + $0x1d0] sm:$0xff] }
  0x58   : > { %1163 = vmatpush3.msra.mxu1 %v532_v8  ;;  %1084 = vmatprep.subr.mxu0 %v515_v9  ;;  %v498_v15 = vld [vmem:[%s1580_s30 + $0x60] sm:$0xff]  ;;  %v497_v19 = vld [vmem:[%s1580_s30 + $0x58] sm:$0xff]  ;;  %v496_v23 = vld [vmem:[%s1580_s30 + $0x50] sm:$0xff] }
  0x59   : > { %1164 = vmatprep.subr.mxu1 %v547_v10  ;;  %v530_v16 = vld [vmem:[%s1580_s30 + $0x160] sm:$0xff]  ;;  %1085 = vmatpush3.msra.mxu0 %v499_v11  ;;  %v529_v20 = vld [vmem:[%s1580_s30 + $0x158] sm:$0xff]  ;;  %v528_v24 = vld [vmem:[%s1580_s30 + $0x150] sm:$0xff] }
  0x5a   : > { %1165 = vmatpush3.msra.mxu1 %v531_v12  ;;  %1086 = vmatprep.subr.mxu0 %v514_v13  ;;  %v511_v25 = vld [vmem:[%s1580_s30 + $0xc8] sm:$0xff]  ;;  %v510_v29 = vld [vmem:[%s1580_s30 + $0xc0] sm:$0xff]  ;;  %v509_v33 = vld [vmem:[%s1580_s30 + $0xb8] sm:$0xff] }
  0x5b   : > { %1166 = vmatprep.subr.mxu1 %v546_v14  ;;  %1087 = vmatpush3.msra.mxu0 %v498_v15  ;;  %v543_v26 = vld [vmem:[%s1580_s30 + $0x1c8] sm:$0xff]  ;;  %v542_v30 = vld [vmem:[%s1580_s30 + $0x1c0] sm:$0xff]  ;;  %v541_v34 = vld [vmem:[%s1580_s30 + $0x1b8] sm:$0xff] }
  0x5c   : > { %1167 = vmatpush3.msra.mxu1 %v530_v16  ;;  %1088 = vmatprep.subr.mxu0 %v513_v17  ;;  %v495_v27 = vld [vmem:[%s1580_s30 + $0x48] sm:$0xff]  ;;  %v494_v31 = vld [vmem:[%s1580_s30 + $0x40] sm:$0xff]  ;;  %v493_v35 = vld [vmem:[%s1580_s30 + $0x38] sm:$0xff] }
  0x5d   : > { %1168 = vmatprep.subr.mxu1 %v545_v18  ;;  %1089 = vmatpush3.msra.mxu0 %v497_v19  ;;  %v527_v28 = vld [vmem:[%s1580_s30 + $0x148] sm:$0xff]  ;;  %v526_v32 = vld [vmem:[%s1580_s30 + $0x140] sm:$0xff]  ;;  %v525_v36 = vld [vmem:[%s1580_s30 + $0x138] sm:$0xff] }
  0x5e   : > { %1169 = vmatpush3.msra.mxu1 %v529_v20  ;;  %1090 = vmatprep.subr.mxu0 %v512_v21  ;;  %v508_v37 = vld [vmem:[%s1580_s30 + $0xb0] sm:$0xff]  ;;  %v507_v41 = vld [vmem:[%s1580_s30 + $0xa8] sm:$0xff]  ;;  %v506_v45 = vld [vmem:[%s1580_s30 + $0xa0] sm:$0xff] }
  0x5f   : > { %1170 = vmatprep.subr.mxu1 %v544_v22  ;;  %1091 = vmatpush3.msra.mxu0 %v496_v23  ;;  %v540_v38 = vld [vmem:[%s1580_s30 + $0x1b0] sm:$0xff]  ;;  %v539_v42 = vld [vmem:[%s1580_s30 + $0x1a8] sm:$0xff]  ;;  %v538_v46 = vld [vmem:[%s1580_s30 + $0x1a0] sm:$0xff] }
  0x60   : > { %1171 = vmatpush3.msra.mxu1 %v528_v24  ;;  %1092 = vmatprep.subr.mxu0 %v511_v25  ;;  %v492_v39 = vld [vmem:[%s1580_s30 + $0x30] sm:$0xff]  ;;  %v491_v43 = vld [vmem:[%s1580_s30 + $0x28] sm:$0xff]  ;;  %v490_v47 = vld [vmem:[%s1580_s30 + $0x20] sm:$0xff] }
  0x61   : > { %1172 = vmatprep.subr.mxu1 %v543_v26  ;;  %1093 = vmatpush3.msra.mxu0 %v495_v27  ;;  %v524_v40 = vld [vmem:[%s1580_s30 + $0x130] sm:$0xff]  ;;  %v523_v44 = vld [vmem:[%s1580_s30 + $0x128] sm:$0xff]  ;;  %v522_v48 = vld [vmem:[%s1580_s30 + $0x120] sm:$0xff] }
  0x62   : > { %1173 = vmatpush3.msra.mxu1 %v527_v28  ;;  %1094 = vmatprep.subr.mxu0 %v510_v29  ;;  %v505_v49 = vld [vmem:[%s1580_s30 + $0x98] sm:$0xff]  ;;  %v504_v53 = vld [vmem:[%s1580_s30 + $0x90] sm:$0xff]  ;;  %v503_v57 = vld [vmem:[%s1580_s30 + $0x88] sm:$0xff] }
  0x63   : > { %1174 = vmatprep.subr.mxu1 %v542_v30  ;;  %1095 = vmatpush3.msra.mxu0 %v494_v31  ;;  %v537_v50 = vld [vmem:[%s1580_s30 + $0x198] sm:$0xff]  ;;  %v536_v54 = vld [vmem:[%s1580_s30 + $0x190] sm:$0xff]  ;;  %v535_v58 = vld [vmem:[%s1580_s30 + $0x188] sm:$0xff] }
  0x64   : > { %1175 = vmatpush3.msra.mxu1 %v526_v32  ;;  %1096 = vmatprep.subr.mxu0 %v509_v33  ;;  %v489_v51 = vld [vmem:[%s1580_s30 + $0x18] sm:$0xff]  ;;  %v488_v55 = vld [vmem:[%s1580_s30 + $0x10] sm:$0xff]  ;;  %v487_v59 = vld [vmem:[%s1580_s30 + $0x8] sm:$0xff] }
  0x65   : > { %1176 = vmatprep.subr.mxu1 %v541_v34  ;;  %1097 = vmatpush3.msra.mxu0 %v493_v35  ;;  %v521_v52 = vld [vmem:[%s1580_s30 + $0x118] sm:$0xff]  ;;  %v520_v56 = vld [vmem:[%s1580_s30 + $0x110] sm:$0xff]  ;;  %v519_v60 = vld [vmem:[%s1580_s30 + $0x108] sm:$0xff] }
  0x66   : > { %1177 = vmatpush3.msra.mxu1 %v525_v36  ;;  %1098 = vmatprep.subr.mxu0 %v508_v37  ;;  %v502_v61 = vld [vmem:[%s1580_s30 + $0x80] sm:$0xff]  ;;  %v423_v0 = vld [vmem:[%s1587_s15 + $0x8] sm:$0xff]  ;;  %v425_v2 = vld [vmem:[%s1587_s15 + $0x18] sm:$0xff] }
  0x67   : > { %1178 = vmatprep.subr.mxu1 %v540_v38  ;;  %1099 = vmatpush3.msra.mxu0 %v492_v39  ;;  %v534_v62 = vld [vmem:[%s1580_s30 + $0x180] sm:$0xff]  ;;  %v424_v4 = vld [vmem:[%s1587_s15 + $0x10] sm:$0xff]  ;;  %v427_v5 = vld [vmem:[%s1587_s15 + $0x28] sm:$0xff] }
  0x68   : > { %1179 = vmatpush3.msra.mxu1 %v524_v40  ;;  %1100 = vmatprep.subr.mxu0 %v507_v41  ;;  %v486_v63 = vld [vmem:[%s1580_s30] sm:$0xff]  ;;  %v429_v6 = vld [vmem:[%s1587_s15 + $0x38] sm:$0xff]  ;;  %v428_v8 = vld [vmem:[%s1587_s15 + $0x30] sm:$0xff] }
  0x69   : > { %1180 = vmatprep.subr.mxu1 %v539_v42  ;;  %1101 = vmatpush3.msra.mxu0 %v491_v43  ;;  %v518_v1 = vld [vmem:[%s1580_s30 + $0x100] sm:$0xff]  ;;  %v431_v9 = vld [vmem:[%s1587_s15 + $0x48] sm:$0xff]  ;;  %v433_v10 = vld [vmem:[%s1587_s15 + $0x58] sm:$0xff] }
  0x6a   : > { %1181 = vmatpush3.msra.mxu1 %v523_v44  ;;  %1102 = vmatprep.subr.mxu0 %v506_v45  ;;  %v422_v3 = vld [vmem:[%s1587_s15] sm:$0xff]  ;;  %v432_v12 = vld [vmem:[%s1587_s15 + $0x50] sm:$0xff]  ;;  %v435_v13 = vld [vmem:[%s1587_s15 + $0x68] sm:$0xff] }
  0x6b   : > { %1182 = vmatprep.subr.mxu1 %v538_v46  ;;  %1103 = vmatpush3.msra.mxu0 %v490_v47  ;;  %v426_v7 = vld [vmem:[%s1587_s15 + $0x20] sm:$0xff]  ;;  %v437_v14 = vld [vmem:[%s1587_s15 + $0x78] sm:$0xff]  ;;  %v436_v16 = vld [vmem:[%s1587_s15 + $0x70] sm:$0xff] }
  0x6c   : > { %1183 = vmatpush3.msra.mxu1 %v522_v48  ;;  %1104 = vmatprep.subr.mxu0 %v505_v49  ;;  %v430_v11 = vld [vmem:[%s1587_s15 + $0x40] sm:$0xff]  ;;  %v439_v17 = vld [vmem:[%s1587_s15 + $0x88] sm:$0xff]  ;;  %v441_v18 = vld [vmem:[%s1587_s15 + $0x98] sm:$0xff] }
  0x6d   : > { %1184 = vmatprep.subr.mxu1 %v537_v50  ;;  %1105 = vmatpush3.msra.mxu0 %v489_v51  ;;  %v434_v15 = vld [vmem:[%s1587_s15 + $0x60] sm:$0xff]  ;;  %v440_v20 = vld [vmem:[%s1587_s15 + $0x90] sm:$0xff]  ;;  %v443_v21 = vld [vmem:[%s1587_s15 + $0xa8] sm:$0xff] }
  0x6e   : > { %1185 = vmatpush3.msra.mxu1 %v521_v52  ;;  %1106 = vmatprep.subr.mxu0 %v504_v53  ;;  %v438_v19 = vld [vmem:[%s1587_s15 + $0x80] sm:$0xff]  ;;  %v445_v22 = vld [vmem:[%s1587_s15 + $0xb8] sm:$0xff]  ;;  %v444_v24 = vld [vmem:[%s1587_s15 + $0xb0] sm:$0xff] }
  0x6f   : > { %1186 = vmatprep.subr.mxu1 %v536_v54  ;;  %1107 = vmatpush3.msra.mxu0 %v488_v55  ;;  %v442_v23 = vld [vmem:[%s1587_s15 + $0xa0] sm:$0xff]  ;;  %v447_v25 = vld [vmem:[%s1587_s15 + $0xc8] sm:$0xff]  ;;  %v449_v26 = vld [vmem:[%s1587_s15 + $0xd8] sm:$0xff] }
  0x70   : > { %1187 = vmatpush3.msra.mxu1 %v520_v56  ;;  %1108 = vmatprep.subr.mxu0 %v503_v57  ;;  %v446_v27 = vld [vmem:[%s1587_s15 + $0xc0] sm:$0xff]  ;;  %v448_v28 = vld [vmem:[%s1587_s15 + $0xd0] sm:$0xff]  ;;  %v451_v29 = vld [vmem:[%s1587_s15 + $0xe8] sm:$0xff] }
  0x71   : > { %1188 = vmatprep.subr.mxu1 %v535_v58  ;;  %1109 = vmatpush3.msra.mxu0 %v487_v59  ;;  %v453_v30 = vld [vmem:[%s1587_s15 + $0xf8] sm:$0xff]  ;;  %v450_v31 = vld [vmem:[%s1587_s15 + $0xe0] sm:$0xff]  ;;  %v452_v32 = vld [vmem:[%s1587_s15 + $0xf0] sm:$0xff] }
  0x72   : > { %1189 = vmatpush3.msra.mxu1 %v519_v60  ;;  %1110 = vmatprep.subr.mxu0 %v502_v61  ;;  %v455_v33 = vld [vmem:[%s1587_s15 + $0x108] sm:$0xff]  ;;  %v457_v34 = vld [vmem:[%s1587_s15 + $0x118] sm:$0xff]  ;;  %v454_v35 = vld [vmem:[%s1587_s15 + $0x100] sm:$0xff] }
  0x73   : > { %1190 = vmatprep.subr.mxu1 %v534_v62  ;;  %1111 = vmatpush3.msra.mxu0 %v486_v63  ;;  %v456_v36 = vld [vmem:[%s1587_s15 + $0x110] sm:$0xff]  ;;  %v459_v37 = vld [vmem:[%s1587_s15 + $0x128] sm:$0xff]  ;;  %v461_v38 = vld [vmem:[%s1587_s15 + $0x138] sm:$0xff] }
  0x74   : > { %614 = vmatprep.mubr.f32.mxu0 %v423_v0  ;;  %1191 = vmatpush3.msra.mxu1 %v518_v1  ;;  %v458_v39 = vld [vmem:[%s1587_s15 + $0x120] sm:$0xff]  ;;  %v460_v40 = vld [vmem:[%s1587_s15 + $0x130] sm:$0xff]  ;;  %v463_v41 = vld [vmem:[%s1587_s15 + $0x148] sm:$0xff] }
  0x75   : > { %759 = vmatprep.mubr.f32.mxu1 %v425_v2  ;;  %615 = vmatmul.mubr.f32.vlgmr.msra.gmra.mxu0 %v422_v3  ;;  %v465_v42 = vld [vmem:[%s1587_s15 + $0x158] sm:$0xff]  ;;  %v462_v43 = vld [vmem:[%s1587_s15 + $0x140] sm:$0xff]  ;;  %v464_v44 = vld [vmem:[%s1587_s15 + $0x150] sm:$0xff] }
  0x76   : > { %760 = vmatmul.mubr.f32.vlgmr.msra.gmra.mxu1 %v424_v4  ;;  %619 = vmatprep.mubr.f32.mxu0 %v427_v5  ;;  %v467_v45 = vld [vmem:[%s1587_s15 + $0x168] sm:$0xff]  ;;  %v469_v46 = vld [vmem:[%s1587_s15 + $0x178] sm:$0xff]  ;;  %v466_v47 = vld [vmem:[%s1587_s15 + $0x160] sm:$0xff] }
  0x77   : > { %764 = vmatprep.mubr.f32.mxu1 %v429_v6  ;;  %v468_v48 = vld [vmem:[%s1587_s15 + $0x170] sm:$0xff]  ;;  %v471_v49 = vld [vmem:[%s1587_s15 + $0x188] sm:$0xff]  ;;  %v473_v50 = vld [vmem:[%s1587_s15 + $0x198] sm:$0xff] }
  0x78   : > { %v470_v51 = vld [vmem:[%s1587_s15 + $0x180] sm:$0xff]  ;;  %v472_v52 = vld [vmem:[%s1587_s15 + $0x190] sm:$0xff]  ;;  %v475_v53 = vld [vmem:[%s1587_s15 + $0x1a8] sm:$0xff] }
  0x79   : > { %620 = vmatmul.mubr.f32.gmra.mxu0 %v426_v7  ;;  %v477_v54 = vld [vmem:[%s1587_s15 + $0x1b8] sm:$0xff]  ;;  %v474_v55 = vld [vmem:[%s1587_s15 + $0x1a0] sm:$0xff]  ;;  %v476_v56 = vld [vmem:[%s1587_s15 + $0x1b0] sm:$0xff] }
  0x7a   : > { %765 = vmatmul.mubr.f32.gmra.mxu1 %v428_v8  ;;  %624 = vmatprep.mubr.f32.mxu0 %v431_v9  ;;  %v479_v57 = vld [vmem:[%s1587_s15 + $0x1c8] sm:$0xff]  ;;  %v481_v58 = vld [vmem:[%s1587_s15 + $0x1d8] sm:$0xff]  ;;  %v478_v59 = vld [vmem:[%s1587_s15 + $0x1c0] sm:$0xff] }
  0x7b   : > { %769 = vmatprep.mubr.f32.mxu1 %v433_v10  ;;  %v480_v60 = vld [vmem:[%s1587_s15 + $0x1d0] sm:$0xff]  ;;  %v483_v61 = vld [vmem:[%s1587_s15 + $0x1e8] sm:$0xff]  ;;  %v485_v62 = vld [vmem:[%s1587_s15 + $0x1f8] sm:$0xff] }
  0x7c   : > { %v482_v63 = vld [vmem:[%s1587_s15 + $0x1e0] sm:$0xff]  ;;  %v484_v0 = vld [vmem:[%s1587_s15 + $0x1f0] sm:$0xff] }
  0x7d   : > { %625 = vmatmul.mubr.f32.gmra.mxu0 %v430_v11  ;;  %v406_v7 = vld [vmem:[#allocation2 + $0x30] sm:$0xff] }
  0x7e   : > { %770 = vmatmul.mubr.f32.gmra.mxu1 %v432_v12  ;;  %629 = vmatprep.mubr.f32.mxu0 %v435_v13 }
  0x7f   : > { %774 = vmatprep.mubr.f32.mxu1 %v437_v14 }
  0x81   : > { %630 = vmatmul.mubr.f32.gmra.mxu0 %v434_v15 }
  0x82   : > { %775 = vmatmul.mubr.f32.gmra.mxu1 %v436_v16  ;;  %634 = vmatprep.mubr.f32.mxu0 %v439_v17  ;;  %v407_v16 = vld [vmem:[#allocation2] sm:$0xff] }
  0x83   : > { %779 = vmatprep.mubr.f32.mxu1 %v441_v18 }
  0x85   : > { %635 = vmatmul.mubr.f32.gmra.mxu0 %v438_v19 }
  0x86   : > { %780 = vmatmul.mubr.f32.gmra.mxu1 %v440_v20  ;;  %639 = vmatprep.mubr.f32.mxu0 %v443_v21 }
  0x87   : > { %784 = vmatprep.mubr.f32.mxu1 %v445_v22 }
  0x89   : > { %640 = vmatmul.mubr.f32.gmra.mxu0 %v442_v23 }
  0x8a   : > { %785 = vmatmul.mubr.f32.gmra.mxu1 %v444_v24  ;;  %644 = vmatprep.mubr.f32.mxu0 %v447_v25  ;;  %v408_v25 = vld [vmem:[#allocation2 + $0x58] sm:$0xff] }
  0x8b   : > { %789 = vmatprep.mubr.f32.mxu1 %v449_v26 }
  0x8d   : > { %645 = vmatmul.mubr.f32.gmra.mxu0 %v446_v27 }
  0x8e   : > { %790 = vmatmul.mubr.f32.gmra.mxu1 %v448_v28  ;;  %649 = vmatprep.mubr.f32.mxu0 %v451_v29 }
  0x8f   : > { %794 = vmatprep.mubr.f32.mxu1 %v453_v30 }
  0x91   : > { %650 = vmatmul.mubr.f32.gmra.mxu0 %v450_v31 }
  0x92   : > { %795 = vmatmul.mubr.f32.gmra.mxu1 %v452_v32  ;;  %654 = vmatprep.mubr.f32.mxu0 %v455_v33 }
  0x93   : > { %799 = vmatprep.mubr.f32.mxu1 %v457_v34  ;;  %v409_v34 = vld [vmem:[#allocation2 + $0x18] sm:$0xff] }
  0x95   : > { %655 = vmatmul.mubr.f32.gmra.mxu0 %v454_v35 }
  0x96   : > { %800 = vmatmul.mubr.f32.gmra.mxu1 %v456_v36  ;;  %659 = vmatprep.mubr.f32.mxu0 %v459_v37 }
  0x97   : > { %804 = vmatprep.mubr.f32.mxu1 %v461_v38 }
  0x99   : > { %660 = vmatmul.mubr.f32.gmra.mxu0 %v458_v39 }
  0x9a   : > { %805 = vmatmul.mubr.f32.gmra.mxu1 %v460_v40  ;;  %664 = vmatprep.mubr.f32.mxu0 %v463_v41 }
  0x9b   : > { %809 = vmatprep.mubr.f32.mxu1 %v465_v42 }
  0x9d   : > { %665 = vmatmul.mubr.f32.gmra.mxu0 %v462_v43  ;;  %v410_v43 = vld [vmem:[#allocation2 + $0x50] sm:$0xff] }
  0x9e   : > { %810 = vmatmul.mubr.f32.gmra.mxu1 %v464_v44  ;;  %669 = vmatprep.mubr.f32.mxu0 %v467_v45 }
  0x9f   : > { %814 = vmatprep.mubr.f32.mxu1 %v469_v46 }
  0xa1   : > { %670 = vmatmul.mubr.f32.gmra.mxu0 %v466_v47 }
  0xa2   : > { %815 = vmatmul.mubr.f32.gmra.mxu1 %v468_v48  ;;  %674 = vmatprep.mubr.f32.mxu0 %v471_v49 }
  0xa3   : > { %819 = vmatprep.mubr.f32.mxu1 %v473_v50 }
  0xa5   : > { %675 = vmatmul.mubr.f32.gmra.mxu0 %v470_v51 }
  0xa6   : > { %820 = vmatmul.mubr.f32.gmra.mxu1 %v472_v52  ;;  %679 = vmatprep.mubr.f32.mxu0 %v475_v53  ;;  %v411_v52 = vld [vmem:[#allocation2 + $0x68] sm:$0xff] }
  0xa7   : > { %824 = vmatprep.mubr.f32.mxu1 %v477_v54 }
  0xa9   : > { %680 = vmatmul.mubr.f32.gmra.mxu0 %v474_v55 }
  0xaa   : > { %825 = vmatmul.mubr.f32.gmra.mxu1 %v476_v56  ;;  %684 = vmatprep.mubr.f32.mxu0 %v479_v57 }
  0xab   : > { %829 = vmatprep.mubr.f32.mxu1 %v481_v58 }
  0xad   : > { %685 = vmatmul.mubr.f32.gmra.mxu0 %v478_v59 }
  0xae   : > { %830 = vmatmul.mubr.f32.gmra.mxu1 %v480_v60  ;;  %689 = vmatprep.mubr.f32.mxu0 %v483_v61  ;;  %v412_v61 = vld [vmem:[#allocation2 + $0x8] sm:$0xff] }
  0xaf   : > { %834 = vmatprep.mubr.f32.mxu1 %v485_v62 }
  0xb1   : > { %690 = vmatmul.mubr.f32.gmra.mxu0 %v482_v63 }
  0xb2   : > { %835 = vmatmul.mubr.f32.gmra.mxu1 %v484_v0 }
 0x135   : > { %v1112_v1 = vpop.f32.mrf.mxu0 }
 0x136   : > { %v1192_v2 = vpop.f32.mrf.mxu1 }
 0x137   : > { %v1113_v3 = vpop.f32.mrf.mxu0 }
 0x138   : > { %v1193_v4 = vpop.f32.mrf.mxu1  ;;  %v1114_v5 = vadd.f32 %v1113_v3, %v1112_v1 }
 0x139   : > { %v1194_v6 = vadd.f32 %v1193_v4, %v1192_v2  ;;  %v1115_v8 = vpop.f32.mrf.mxu0 }
 0x13a   : > { %v1195_v9 = vpop.f32.mrf.mxu1 }
 0x13b   : > { %v762_v10 = vadd.f32 %v1194_v6, %v1114_v5  ;;  %v1116_v11 = vpop.f32.mrf.mxu0  ;;  %v413_v6 = vld [vmem:[#allocation2 + $0x48] sm:$0xff] }
 0x13c   : > { %v1196_v12 = vpop.f32.mrf.mxu1  ;;  %v1117_v14 = vadd.f32 %v1116_v11, %v1115_v8 }
 0x13d   : > { %v840_v13 = vadd.f32 %v762_v10, %v406_v7  ;;  %v1197_v15 = vadd.f32 %v1196_v12, %v1195_v9  ;;  %v1118_v17 = vpop.f32.mrf.mxu0 }
 0x13e   : > { %v1198_v18 = vpop.f32.mrf.mxu1 }
 0x13f   : > { %856 = vst [vmem:[#allocation2 + $0x30] sm:$0xff] %v840_v13  ;;  %v767_v19 = vadd.f32 %v1197_v15, %v1117_v14  ;;  %v1119_v20 = vpop.f32.mrf.mxu0  ;;  %v414_v15 = vld [vmem:[#allocation2 + $0x40] sm:$0xff] }
 0x140   : > { %v1199_v21 = vpop.f32.mrf.mxu1  ;;  %v1120_v23 = vadd.f32 %v1119_v20, %v1118_v17 }
 0x141   : > { %v841_v22 = vadd.f32 %v767_v19, %v407_v16  ;;  %v1200_v24 = vadd.f32 %v1199_v21, %v1198_v18  ;;  %v1121_v26 = vpop.f32.mrf.mxu0 }
 0x142   : > { %v1201_v27 = vpop.f32.mrf.mxu1 }
 0x143   : > { %857 = vst [vmem:[#allocation2] sm:$0xff] %v841_v22  ;;  %v772_v28 = vadd.f32 %v1200_v24, %v1120_v23  ;;  %v1122_v29 = vpop.f32.mrf.mxu0  ;;  %v415_v24 = vld [vmem:[#allocation2 + $0x20] sm:$0xff] }
 0x144   : > { %v1202_v30 = vpop.f32.mrf.mxu1  ;;  %v1123_v32 = vadd.f32 %v1122_v29, %v1121_v26 }
 0x145   : > { %v842_v31 = vadd.f32 %v772_v28, %v408_v25  ;;  %v1203_v33 = vadd.f32 %v1202_v30, %v1201_v27  ;;  %v1124_v35 = vpop.f32.mrf.mxu0 }
 0x146   : > { %v1204_v36 = vpop.f32.mrf.mxu1 }
 0x147   : > { %858 = vst [vmem:[#allocation2 + $0x58] sm:$0xff] %v842_v31  ;;  %v777_v37 = vadd.f32 %v1203_v33, %v1123_v32  ;;  %v1125_v38 = vpop.f32.mrf.mxu0  ;;  %v416_v33 = vld [vmem:[#allocation2 + $0x10] sm:$0xff] }
 0x148   : > { %v1205_v39 = vpop.f32.mrf.mxu1  ;;  %v1126_v41 = vadd.f32 %v1125_v38, %v1124_v35 }
 0x149   : > { %v843_v40 = vadd.f32 %v777_v37, %v409_v34  ;;  %v1206_v42 = vadd.f32 %v1205_v39, %v1204_v36  ;;  %v1127_v44 = vpop.f32.mrf.mxu0 }
 0x14a   : > { %v1207_v45 = vpop.f32.mrf.mxu1 }
 0x14b   : > { %859 = vst [vmem:[#allocation2 + $0x18] sm:$0xff] %v843_v40  ;;  %v782_v46 = vadd.f32 %v1206_v42, %v1126_v41  ;;  %v1128_v47 = vpop.f32.mrf.mxu0  ;;  %v417_v42 = vld [vmem:[#allocation2 + $0x38] sm:$0xff] }
 0x14c   : > { %v1208_v48 = vpop.f32.mrf.mxu1  ;;  %v1129_v50 = vadd.f32 %v1128_v47, %v1127_v44 }
 0x14d   : > { %v844_v49 = vadd.f32 %v782_v46, %v410_v43  ;;  %v1209_v51 = vadd.f32 %v1208_v48, %v1207_v45  ;;  %v1130_v53 = vpop.f32.mrf.mxu0 }
 0x14e   : > { %v1210_v54 = vpop.f32.mrf.mxu1 }
 0x14f   : > { %860 = vst [vmem:[#allocation2 + $0x50] sm:$0xff] %v844_v49  ;;  %v787_v55 = vadd.f32 %v1209_v51, %v1129_v50  ;;  %v1131_v56 = vpop.f32.mrf.mxu0  ;;  %v418_v51 = vld [vmem:[#allocation2 + $0x60] sm:$0xff] }
 0x150   : > { %v1211_v57 = vpop.f32.mrf.mxu1  ;;  %v1132_v59 = vadd.f32 %v1131_v56, %v1130_v53 }
 0x151   : > { %v845_v58 = vadd.f32 %v787_v55, %v411_v52  ;;  %v1212_v60 = vadd.f32 %v1211_v57, %v1210_v54  ;;  %v1133_v62 = vpop.f32.mrf.mxu0 }
 0x152   : > { %v1213_v63 = vpop.f32.mrf.mxu1 }
 0x153   : > { %861 = vst [vmem:[#allocation2 + $0x68] sm:$0xff] %v845_v58  ;;  %v792_v0 = vadd.f32 %v1212_v60, %v1132_v59  ;;  %v1134_v1 = vpop.f32.mrf.mxu0  ;;  %v419_v60 = vld [vmem:[#allocation2 + $0x70] sm:$0xff] }
 0x154   : > { %v1214_v2 = vpop.f32.mrf.mxu1  ;;  %v1135_v4 = vadd.f32 %v1134_v1, %v1133_v62 }
 0x155   : > { %v846_v3 = vadd.f32 %v792_v0, %v412_v61  ;;  %v1215_v5 = vadd.f32 %v1214_v2, %v1213_v63  ;;  %v1136_v7 = vpop.f32.mrf.mxu0 }
 0x156   : > { %v1216_v8 = vpop.f32.mrf.mxu1 }
 0x157   : > { %862 = vst [vmem:[#allocation2 + $0x8] sm:$0xff] %v846_v3  ;;  %v797_v9 = vadd.f32 %v1215_v5, %v1135_v4  ;;  %v1137_v10 = vpop.f32.mrf.mxu0  ;;  %v420_v5 = vld [vmem:[#allocation2 + $0x78] sm:$0xff] }
 0x158   : > { %v1217_v11 = vpop.f32.mrf.mxu1  ;;  %v1138_v13 = vadd.f32 %v1137_v10, %v1136_v7 }
 0x159   : > { %v847_v12 = vadd.f32 %v797_v9, %v413_v6  ;;  %v1218_v14 = vadd.f32 %v1217_v11, %v1216_v8  ;;  %v1139_v16 = vpop.f32.mrf.mxu0 }
 0x15a   : > { %v1219_v17 = vpop.f32.mrf.mxu1 }
 0x15b   : > { %863 = vst [vmem:[#allocation2 + $0x48] sm:$0xff] %v847_v12  ;;  %v802_v18 = vadd.f32 %v1218_v14, %v1138_v13  ;;  %v1140_v19 = vpop.f32.mrf.mxu0  ;;  %v421_v14 = vld [vmem:[#allocation2 + $0x28] sm:$0xff] }
 0x15c   : > { %v1220_v20 = vpop.f32.mrf.mxu1  ;;  %v1141_v22 = vadd.f32 %v1140_v19, %v1139_v16 }
 0x15d   : > { %v848_v21 = vadd.f32 %v802_v18, %v414_v15  ;;  %v1221_v23 = vadd.f32 %v1220_v20, %v1219_v17  ;;  %v1142_v25 = vpop.f32.mrf.mxu0 }
 0x15e   : > { %v1222_v26 = vpop.f32.mrf.mxu1 }
 0x15f   : > { %864 = vst [vmem:[#allocation2 + $0x40] sm:$0xff] %v848_v21  ;;  %v807_v27 = vadd.f32 %v1221_v23, %v1141_v22  ;;  %v1143_v28 = vpop.f32.mrf.mxu0 }
 0x160   : > { %v1223_v29 = vpop.f32.mrf.mxu1  ;;  %v1144_v31 = vadd.f32 %v1143_v28, %v1142_v25 }
 0x161   : > { %v849_v30 = vadd.f32 %v807_v27, %v415_v24  ;;  %v1224_v32 = vadd.f32 %v1223_v29, %v1222_v26  ;;  %v1145_v34 = vpop.f32.mrf.mxu0 }
 0x162   : > { %v1225_v35 = vpop.f32.mrf.mxu1 }
 0x163   : > { %865 = vst [vmem:[#allocation2 + $0x20] sm:$0xff] %v849_v30  ;;  %v812_v36 = vadd.f32 %v1224_v32, %v1144_v31  ;;  %v1146_v37 = vpop.f32.mrf.mxu0 }
 0x164   : > { %v1226_v38 = vpop.f32.mrf.mxu1  ;;  %v1147_v40 = vadd.f32 %v1146_v37, %v1145_v34 }
 0x165   : > { %v850_v39 = vadd.f32 %v812_v36, %v416_v33  ;;  %v1227_v41 = vadd.f32 %v1226_v38, %v1225_v35  ;;  %v1148_v43 = vpop.f32.mrf.mxu0 }
 0x166   : > { %v1228_v44 = vpop.f32.mrf.mxu1 }
 0x167   : > { %866 = vst [vmem:[#allocation2 + $0x10] sm:$0xff] %v850_v39  ;;  %v817_v45 = vadd.f32 %v1227_v41, %v1147_v40  ;;  %v1149_v46 = vpop.f32.mrf.mxu0 }
 0x168   : > { %v1229_v47 = vpop.f32.mrf.mxu1  ;;  %v1150_v49 = vadd.f32 %v1149_v46, %v1148_v43 }
 0x169   : > { %v851_v48 = vadd.f32 %v817_v45, %v417_v42  ;;  %v1230_v50 = vadd.f32 %v1229_v47, %v1228_v44  ;;  %v1151_v52 = vpop.f32.mrf.mxu0 }
 0x16a   : > { %v1231_v53 = vpop.f32.mrf.mxu1 }
 0x16b   : > { %867 = vst [vmem:[#allocation2 + $0x38] sm:$0xff] %v851_v48  ;;  %v822_v54 = vadd.f32 %v1230_v50, %v1150_v49  ;;  %v1152_v55 = vpop.f32.mrf.mxu0 }
 0x16c   : > { %v1232_v56 = vpop.f32.mrf.mxu1  ;;  %v1153_v58 = vadd.f32 %v1152_v55, %v1151_v52 }
 0x16d   : > { %v852_v57 = vadd.f32 %v822_v54, %v418_v51  ;;  %v1233_v59 = vadd.f32 %v1232_v56, %v1231_v53  ;;  %v1154_v61 = vpop.f32.mrf.mxu0 }
 0x16e   : > { %v1234_v62 = vpop.f32.mrf.mxu1 }
 0x16f   : > { %868 = vst [vmem:[#allocation2 + $0x60] sm:$0xff] %v852_v57  ;;  %v827_v63 = vadd.f32 %v1233_v59, %v1153_v58  ;;  %v1155_v0 = vpop.f32.mrf.mxu0 }
 0x170   : > { %v1235_v1 = vpop.f32.mrf.mxu1  ;;  %v1156_v3 = vadd.f32 %v1155_v0, %v1154_v61 }
 0x171   : > { %v853_v2 = vadd.f32 %v827_v63, %v419_v60  ;;  %v1236_v4 = vadd.f32 %v1235_v1, %v1234_v62  ;;  %v1157_v6 = vpop.f32.mrf.mxu0 }
 0x172   : > { %v1237_v7 = vpop.f32.mrf.mxu1 }
 0x173   : > { %869 = vst [vmem:[#allocation2 + $0x70] sm:$0xff] %v853_v2  ;;  %v832_v8 = vadd.f32 %v1236_v4, %v1156_v3  ;;  %v1158_v9 = vpop.f32.mrf.mxu0 }
 0x174   : > { %v1238_v10 = vpop.f32.mrf.mxu1  ;;  %v1159_v12 = vadd.f32 %v1158_v9, %v1157_v6 }
 0x175   : > { %v854_v11 = vadd.f32 %v832_v8, %v420_v5  ;;  %v1239_v13 = vadd.f32 %v1238_v10, %v1237_v7 }
 0x177   : > { %870 = vst [vmem:[#allocation2 + $0x78] sm:$0xff] %v854_v11  ;;  %v837_v15 = vadd.f32 %v1239_v13, %v1159_v12  ;;  %875 = sbr.rel (%p1075_p13) target bundleno = 398 (0x18e), region = 67 }
 0x179   : > { %v855_v16 = vadd.f32 %v837_v15, %v421_v14 }
 0x17b   : > { %871 = vst [vmem:[#allocation2 + $0x28] sm:$0xff] %v855_v16 }
 0x17c   : > { %v876_v17 = vld [vmem:[#allocation2 + $0x30] sm:$0xff]  ;;  %v1076_v18 = vld [vmem:[%s1782_s2] ss:$0 sm:$0xff]  ;;  %v878_v22 = vld [vmem:[#allocation2 + $0x58] sm:$0xff] }
 0x17d   : > { %v1725_v19 = vld [vmem:[%s1783_s3] ss:$0 sm:$0xff]  ;;  %v899_v20 = vmul.f32 %v1076_v18, %v876_v17  ;;  %v879_v23 = vld [vmem:[#allocation2 + $0x18] sm:$0xff]  ;;  %v901_v25 = vmul.f32 %v1076_v18, %v878_v22  ;;  %v880_v27 = vld [vmem:[#allocation2 + $0x50] sm:$0xff] }
 0x17e   : > { %v877_v21 = vld [vmem:[#allocation2] sm:$0xff]  ;;  %v902_v26 = vmul.f32 %v1076_v18, %v879_v23  ;;  %v881_v28 = vld [vmem:[#allocation2 + $0x68] sm:$0xff]  ;;  %v903_v31 = vmul.f32 %v1076_v18, %v880_v27  ;;  %v886_v45 = vld [vmem:[#allocation2 + $0x10] sm:$0xff] }
 0x17f   : > { %v900_v24 = vmul.f32 %v1076_v18, %v877_v21  ;;  %v882_v29 = vld [vmem:[#allocation2 + $0x8] sm:$0xff]  ;;  %v922_v30 = vadd.f32 %v1725_v19, %v899_v20  ;;  %v904_v32 = vmul.f32 %v1076_v18, %v881_v28  ;;  %v924_v36 = vadd.f32 %v1725_v19, %v901_v25  ;;  %v884_v39 = vld [vmem:[#allocation2 + $0x40] sm:$0xff]  ;;  %v887_v46 = vld [vmem:[#allocation2 + $0x38] sm:$0xff] }
 0x180   : > { %v905_v33 = vmul.f32 %v1076_v18, %v882_v29  ;;  %v883_v34 = vld [vmem:[#allocation2 + $0x48] sm:$0xff]  ;;  %v925_v37 = vadd.f32 %v1725_v19, %v902_v26  ;;  %v926_v41 = vadd.f32 %v1725_v19, %v903_v31  ;;  %v885_v44 = vld [vmem:[#allocation2 + $0x20] sm:$0xff]  ;;  %v889_v52 = vld [vmem:[#allocation2 + $0x70] sm:$0xff]  ;;  %v907_v57 = vmul.f32 %v1076_v18, %v884_v39 }
 0x181   : > { %v923_v35 = vadd.f32 %v1725_v19, %v900_v24  ;;  %v906_v38 = vmul.f32 %v1076_v18, %v883_v34  ;;  %v938_v40 = vmax.f32 %v922_v30, 0.0  ;;  %v927_v42 = vadd.f32 %v1725_v19, %v904_v32  ;;  %v888_v51 = vld [vmem:[#allocation2 + $0x60] sm:$0xff]  ;;  %v890_v53 = vld [vmem:[#allocation2 + $0x78] sm:$0xff] }
 0x182   : > { %v928_v43 = vadd.f32 %v1725_v19, %v905_v33  ;;  %v940_v48 = vmax.f32 %v924_v36, 0.0  ;;  %v941_v49 = vmax.f32 %v925_v37, 0.0  ;;  %v942_v54 = vmax.f32 %v926_v41, 0.0  ;;  %v891_v58 = vld [vmem:[#allocation2 + $0x28] sm:$0xff] }
 0x183   : > { %v939_v47 = vmax.f32 %v923_v35, 0.0  ;;  %v929_v50 = vadd.f32 %v1725_v19, %v906_v38  ;;  %954 = vst [vmem:[%s1585_s8] sm:$0xff] %v938_v40  ;;  %v943_v55 = vmax.f32 %v927_v42, 0.0  ;;  %v908_v60 = vmul.f32 %v1076_v18, %v885_v44 }
 0x184   : > { %v944_v56 = vmax.f32 %v928_v43, 0.0  ;;  %956 = vst [vmem:[%s1585_s8 + $0x10] sm:$0xff] %v940_v48  ;;  %957 = vst [vmem:[%s1585_s8 + $0x18] sm:$0xff] %v941_v49  ;;  %v909_v61 = vmul.f32 %v1076_v18, %v886_v45  ;;  %v910_v62 = vmul.f32 %v1076_v18, %v887_v46  ;;  %v930_v63 = vadd.f32 %v1725_v19, %v907_v57 }
 0x185   : > { %955 = vst [vmem:[%s1585_s8 + $0x8] sm:$0xff] %v939_v47  ;;  %v945_v59 = vmax.f32 %v929_v50, 0.0  ;;  %958 = vst [vmem:[%s1585_s8 + $0x20] sm:$0xff] %v942_v54  ;;  %v911_v0 = vmul.f32 %v1076_v18, %v888_v51  ;;  %v912_v1 = vmul.f32 %v1076_v18, %v889_v52  ;;  %v913_v2 = vmul.f32 %v1076_v18, %v890_v53 }
 0x186   : > { %959 = vst [vmem:[%s1585_s8 + $0x28] sm:$0xff] %v943_v55  ;;  %960 = vst [vmem:[%s1585_s8 + $0x30] sm:$0xff] %v944_v56  ;;  %v931_v3 = vadd.f32 %v1725_v19, %v908_v60  ;;  %v932_v4 = vadd.f32 %v1725_v19, %v909_v61  ;;  %v933_v5 = vadd.f32 %v1725_v19, %v910_v62  ;;  %v946_v7 = vmax.f32 %v930_v63, 0.0 }
 0x187   : > { %961 = vst [vmem:[%s1585_s8 + $0x38] sm:$0xff] %v945_v59  ;;  %v914_v6 = vmul.f32 %v1076_v18, %v891_v58  ;;  %v934_v8 = vadd.f32 %v1725_v19, %v911_v0  ;;  %v935_v9 = vadd.f32 %v1725_v19, %v912_v1  ;;  %v936_v10 = vadd.f32 %v1725_v19, %v913_v2 }
 0x188   : > { %v947_v11 = vmax.f32 %v931_v3, 0.0  ;;  %v948_v12 = vmax.f32 %v932_v4, 0.0  ;;  %v949_v13 = vmax.f32 %v933_v5, 0.0  ;;  %962 = vst [vmem:[%s1585_s8 + $0x40] sm:$0xff] %v946_v7 }
 0x189   : > { %v937_v14 = vadd.f32 %v1725_v19, %v914_v6  ;;  %v950_v15 = vmax.f32 %v934_v8, 0.0  ;;  %v951_v16 = vmax.f32 %v935_v9, 0.0  ;;  %v952_v17 = vmax.f32 %v936_v10, 0.0 }
 0x18a   : > { %963 = vst [vmem:[%s1585_s8 + $0x48] sm:$0xff] %v947_v11  ;;  %964 = vst [vmem:[%s1585_s8 + $0x50] sm:$0xff] %v948_v12 }
 0x18b   : > { %965 = vst [vmem:[%s1585_s8 + $0x58] sm:$0xff] %v949_v13  ;;  %v953_v18 = vmax.f32 %v937_v14, 0.0  ;;  %966 = vst [vmem:[%s1585_s8 + $0x60] sm:$0xff] %v950_v15 }
 0x18c   : > { %967 = vst [vmem:[%s1585_s8 + $0x68] sm:$0xff] %v951_v16  ;;  %968 = vst [vmem:[%s1585_s8 + $0x70] sm:$0xff] %v952_v17 }
 0x18d   : > { %969 = vst [vmem:[%s1585_s8 + $0x78] sm:$0xff] %v953_v18 }
 0x18e PF: > { %s14_s21 = sadd.s32 1, %s1352_s21   ;;  %s1785_s15 = smov %s1332_s16 }
 0x18f   : > { %p11_p0 = scmp.ge.s32.totalorder %s14_s21, 46   ;;  %s1786_s16 = smov %s1431_s28 }
 0x190   : > { %s1787_s17 = smov %s1344_s19  ;;  %s1788_s18 = smov %s1348_s20 }
 0x191   : > { %s1789_s19 = smov %s1792_s22  ;;  %s1790_s20 = smov %s1796_s23 }
 0x192   :  { %13 = sbr.rel (!%p11_p0) target bundleno = 4 (0x4), region = 105 }

// kernel: feature_regression_forward.4
= control target key start
LH: loop header
LB: loop body
LE: loop exit
PB: predicated region body
PF: predicated region fallthrough
CT: control target
= control target key end

     0   :  { %s1008_s15 = smov 0   ;;  %s1010_s16 = smov 0   ;;  %s1272_s0 = inlined_call_operand.vmem [shape: f32[56,3584], index: 0, kind: input, shape index: {}]   ;;  %s1273_s1 = inlined_call_operand.vmem [shape: f32[3584,64], index: 1, kind: input, shape index: {}]   ;;  %s1274_s2 = inlined_call_operand.vmem [shape: f32[1,64], index: 2, kind: input, shape index: {}]   ;;  %s1275_s3 = inlined_call_operand.vmem [shape: f32[1,64], index: 3, kind: input, shape index: {}]   ;;  %s1276_s4 = inlined_call_operand.vmem [shape: f32[56,64], index: 4, kind: output, shape index: {}]  }
   0x1   :  { %s1012_s17 = smov 0   ;;  %s1014_s18 = smov 0  }
   0x2   :  { %s1016_s19 = smov 0  }
   0x3 LB: > { %s23_s20 = sadd.s32 1, %s976_s18  ;;  %p42_p1 = scmp.ne.s32.totalorder %s968_s16, %s964_s15  ;;  %s980_s19 = sphi %s1016_s19, %s14_s19   ;;  %s976_s18 = sphi %s1014_s18, %s1280_s18   ;;  %s972_s17 = sphi %s1012_s17, %s1279_s17   ;;  %s968_s16 = sphi %s1010_s16, %s1278_s16   ;;  %s964_s15 = sphi %s1008_s15, %s1277_s15  }
   0x4   : > { %p24_p0 = scmp.ge.s32.totalorder %s23_s20, 7  ;;  %p43_p2 = scmp.eq.s32.totalorder %s980_s19, 0 }
   0x5   : > { %s35_s22 = sadd.s32 1, %s968_s16  ;;  %p778_p5 = scmp.ge.s32.totalorder %s980_s19, 7 }
   0x6   : > { %s1282_s20 = smov (%p24_p0, %s23_s20), 0  ;;  %p44_p3 = por %p43_p2, %p42_p1 }
   0x7   : > { %s31_s21 = ssub.s32 %s976_s18, %s1282_s20  ;;  %168 = sbr.rel (%p778_p5) target bundleno = 31 (0x1f), region = 24 }
   0x8   : > { %p33_p4 = scmp.eq.s32.totalorder %s31_s21, 0 }
   0xa   : > { %s1043_s23 = scalar_select %p33_p4, %s968_s16, %s35_s22  }
   0xc   : > { %171 = sbr.rel (!%p44_p3) target bundleno = 31 (0x1f), region = 28  ;;  %s173_s24 = sand.u32 (%p44_p3), 1, %s968_s16  }
   0xd   : > { %s792_s25 = sshll.u32 (%p44_p3), %s976_s18, 5  ;;  %s899_s26 = smul.u32 (%p44_p3), 224, %s173_s24 }
   0xe   : > { %s1051_s29 = scalar_lea.vmem (%p44_p3), %s1272_s0, %s792_s25 }
   0xf   : > { %v194_v0 = vld [vmem:[%s1051_s29] sm:$0xff] (%p44_p3)  ;;  %v196_v1 = vld [vmem:[%s1051_s29 + $0x8] sm:$0xff] (%p44_p3)  ;;  %v198_v2 = vld [vmem:[%s1051_s29 + $0x10] sm:$0xff] (%p44_p3)  ;;  %s1059_s30 = scalar_lea.vmem (%p44_p3), [#allocation3], %s899_s26 }
  0x10   : > { %v200_v3 = vld [vmem:[%s1051_s29 + $0x18] sm:$0xff] (%p44_p3)  ;;  %v202_v4 = vld [vmem:[%s1051_s29 + $0xe0] sm:$0xff] (%p44_p3)  ;;  %v204_v5 = vld [vmem:[%s1051_s29 + $0xe8] sm:$0xff] (%p44_p3)  ;;  %195 = vst [vmem:[%s1059_s30] sm:$0xff] (%p44_p3), %v194_v0 }
  0x11   : > { %197 = vst [vmem:[%s1059_s30 + $0x8] sm:$0xff] %v196_v1  ;;  %199 = vst [vmem:[%s1059_s30 + $0x10] sm:$0xff] %v198_v2  ;;  %v206_v6 = vld [vmem:[%s1051_s29 + $0xf0] sm:$0xff]  ;;  %v208_v7 = vld [vmem:[%s1051_s29 + $0xf8] sm:$0xff] }
  0x12   : > { %201 = vst [vmem:[%s1059_s30 + $0x18] sm:$0xff] %v200_v3  ;;  %203 = vst [vmem:[%s1059_s30 + $0x20] sm:$0xff] %v202_v4  ;;  %v210_v8 = vld [vmem:[%s1051_s29 + $0x1c0] sm:$0xff]  ;;  %v212_v9 = vld [vmem:[%s1051_s29 + $0x1c8] sm:$0xff] }
  0x13   : > { %205 = vst [vmem:[%s1059_s30 + $0x28] sm:$0xff] %v204_v5  ;;  %207 = vst [vmem:[%s1059_s30 + $0x30] sm:$0xff] %v206_v6  ;;  %v214_v10 = vld [vmem:[%s1051_s29 + $0x1d0] sm:$0xff]  ;;  %v216_v11 = vld [vmem:[%s1051_s29 + $0x1d8] sm:$0xff] }
  0x14   : > { %209 = vst [vmem:[%s1059_s30 + $0x38] sm:$0xff] %v208_v7  ;;  %211 = vst [vmem:[%s1059_s30 + $0x40] sm:$0xff] %v210_v8  ;;  %v218_v12 = vld [vmem:[%s1051_s29 + $0x2a0] sm:$0xff]  ;;  %v220_v13 = vld [vmem:[%s1051_s29 + $0x2a8] sm:$0xff] }
  0x15   : > { %213 = vst [vmem:[%s1059_s30 + $0x48] sm:$0xff] %v212_v9  ;;  %215 = vst [vmem:[%s1059_s30 + $0x50] sm:$0xff] %v214_v10  ;;  %v222_v14 = vld [vmem:[%s1051_s29 + $0x2b0] sm:$0xff]  ;;  %v224_v15 = vld [vmem:[%s1051_s29 + $0x2b8] sm:$0xff] }
  0x16   : > { %217 = vst [vmem:[%s1059_s30 + $0x58] sm:$0xff] %v216_v11  ;;  %219 = vst [vmem:[%s1059_s30 + $0x60] sm:$0xff] %v218_v12  ;;  %v226_v16 = vld [vmem:[%s1051_s29 + $0x380] sm:$0xff]  ;;  %v228_v17 = vld [vmem:[%s1051_s29 + $0x388] sm:$0xff] }
  0x17   : > { %221 = vst [vmem:[%s1059_s30 + $0x68] sm:$0xff] %v220_v13  ;;  %223 = vst [vmem:[%s1059_s30 + $0x70] sm:$0xff] %v222_v14  ;;  %v230_v18 = vld [vmem:[%s1051_s29 + $0x390] sm:$0xff]  ;;  %v232_v19 = vld [vmem:[%s1051_s29 + $0x398] sm:$0xff] }
  0x18   : > { %225 = vst [vmem:[%s1059_s30 + $0x78] sm:$0xff] %v224_v15  ;;  %227 = vst [vmem:[%s1059_s30 + $0x80] sm:$0xff] %v226_v16  ;;  %v234_v20 = vld [vmem:[%s1051_s29 + $0x460] sm:$0xff]  ;;  %v236_v21 = vld [vmem:[%s1051_s29 + $0x468] sm:$0xff] }
  0x19   : > { %229 = vst [vmem:[%s1059_s30 + $0x88] sm:$0xff] %v228_v17  ;;  %231 = vst [vmem:[%s1059_s30 + $0x90] sm:$0xff] %v230_v18  ;;  %v238_v22 = vld [vmem:[%s1051_s29 + $0x470] sm:$0xff]  ;;  %v240_v23 = vld [vmem:[%s1051_s29 + $0x478] sm:$0xff] }
  0x1a   : > { %233 = vst [vmem:[%s1059_s30 + $0x98] sm:$0xff] %v232_v19  ;;  %235 = vst [vmem:[%s1059_s30 + $0xa0] sm:$0xff] %v234_v20  ;;  %v242_v24 = vld [vmem:[%s1051_s29 + $0x540] sm:$0xff]  ;;  %v244_v25 = vld [vmem:[%s1051_s29 + $0x548] sm:$0xff] }
  0x1b   : > { %237 = vst [vmem:[%s1059_s30 + $0xa8] sm:$0xff] %v236_v21  ;;  %239 = vst [vmem:[%s1059_s30 + $0xb0] sm:$0xff] %v238_v22  ;;  %v246_v26 = vld [vmem:[%s1051_s29 + $0x550] sm:$0xff]  ;;  %v248_v27 = vld [vmem:[%s1051_s29 + $0x558] sm:$0xff] }
  0x1c   : > { %241 = vst [vmem:[%s1059_s30 + $0xb8] sm:$0xff] %v240_v23  ;;  %243 = vst [vmem:[%s1059_s30 + $0xc0] sm:$0xff] %v242_v24 }
  0x1d   : > { %245 = vst [vmem:[%s1059_s30 + $0xc8] sm:$0xff] %v244_v25  ;;  %247 = vst [vmem:[%s1059_s30 + $0xd0] sm:$0xff] %v246_v26 }
  0x1e   : > { %249 = vst [vmem:[%s1059_s30 + $0xd8] sm:$0xff] %v248_v27 }
  0x1f PF: > { %p781_p6 = scmp.ge.s32.totalorder %s980_s19, 1  ;;  %p263_p7 = scmp.lt.s32.totalorder %s980_s19, 8 }
  0x21   : > { %p264_p8 = pnand %p781_p6, %p263_p7 }
  0x22   : > { %s270_s5 = sand.u32 (!%p264_p8), 1, %s964_s15   ;;  %s782_s6 = sshll.u32 (!%p264_p8), %s972_s17, 6 }
  0x23   : > { %267 = sbr.rel (%p264_p8) target bundleno = 326 (0x146), region = 55  ;;  %p303_p9 = scmp.lt.s32.totalorder (!%p264_p8), %s782_s6, 447 }
  0x24   : > { %s900_s7 = smul.u32 (!%p264_p8), 224, %s270_s5  ;;  %p784_p10 = scmp.ne.s32.totalorder (!%p264_p8), %s972_s17, 0 }
  0x26   : > { %s1120_s12 = scalar_lea.vmem (!%p264_p8), [#allocation3], %s900_s7 }
  0x28   : > { %s1284_s6 = smov (!%p303_p9, %s782_s6), 447  ;;  %317 = sbr.rel (%p784_p10) target bundleno = 50 (0x32), region = 63 }
  0x29   : > { %s783_s8 = sshll.u32 %s1284_s6, 3 }
  0x2a   : > { %s1118_s11 = scalar_lea.vmem %s1273_s1, %s783_s8 }
  0x2d   : > { %vm318_vm0 = vcmask 523264   ;;  %v982_v28 = vmov 0.0  }
  0x2e   : > { %319 = vst.msk [vmem:[#allocation2] sm:$0xff] %vm318_vm0, %v982_v28  ;;  %320 = vst.msk [vmem:[#allocation2 + $0x8] sm:$0xff] %vm318_vm0, %v982_v28 }
  0x2f   : > { %321 = vst.msk [vmem:[#allocation2 + $0x10] sm:$0xff] %vm318_vm0, %v982_v28  ;;  %322 = vst.msk [vmem:[#allocation2 + $0x18] sm:$0xff] %vm318_vm0, %v982_v28 }
  0x30   : > { %323 = vst.msk [vmem:[#allocation2 + $0x20] sm:$0xff] %vm318_vm0, %v982_v28  ;;  %324 = vst.msk [vmem:[#allocation2 + $0x28] sm:$0xff] %vm318_vm0, %v982_v28 }
  0x31   : > { %325 = vst.msk [vmem:[#allocation2 + $0x30] sm:$0xff] %vm318_vm0, %v982_v28 }
  0x32 PF: > { %v392_v29 = vld [vmem:[%s1118_s11 + $0xf8] sm:$0xff]  ;;  %v391_v33 = vld [vmem:[%s1118_s11 + $0xf0] sm:$0xff]  ;;  %v390_v37 = vld [vmem:[%s1118_s11 + $0xe8] sm:$0xff]  ;;  %vm632_vm1 = vcmask 523264   ;;  %p785_p11 = scmp.ne.s32.totalorder %s972_s17, 6 }
  0x33   : > { %v424_v30 = vld [vmem:[%s1118_s11 + $0x1f8] sm:$0xff]  ;;  %793 = vmatprep.subr.mxu0 %v392_v29  ;;  %v423_v34 = vld [vmem:[%s1118_s11 + $0x1f0] sm:$0xff]  ;;  %v422_v38 = vld [vmem:[%s1118_s11 + $0x1e8] sm:$0xff] }
  0x34   : > { %v376_v31 = vld [vmem:[%s1118_s11 + $0x78] sm:$0xff]  ;;  %846 = vmatprep.subr.mxu1 %v424_v30  ;;  %v375_v35 = vld [vmem:[%s1118_s11 + $0x70] sm:$0xff]  ;;  %v374_v39 = vld [vmem:[%s1118_s11 + $0x68] sm:$0xff] }
  0x35   : > { %v408_v32 = vld [vmem:[%s1118_s11 + $0x178] sm:$0xff]  ;;  %794 = vmatpush3.msra.mxu0 %v376_v31  ;;  %v407_v36 = vld [vmem:[%s1118_s11 + $0x170] sm:$0xff]  ;;  %v406_v40 = vld [vmem:[%s1118_s11 + $0x168] sm:$0xff] }
  0x36   : > { %847 = vmatpush3.msra.mxu1 %v408_v32  ;;  %795 = vmatprep.subr.mxu0 %v391_v33  ;;  %v389_v41 = vld [vmem:[%s1118_s11 + $0xe0] sm:$0xff]  ;;  %v388_v45 = vld [vmem:[%s1118_s11 + $0xd8] sm:$0xff]  ;;  %v387_v49 = vld [vmem:[%s1118_s11 + $0xd0] sm:$0xff] }
  0x37   : > { %848 = vmatprep.subr.mxu1 %v423_v34  ;;  %796 = vmatpush3.msra.mxu0 %v375_v35  ;;  %v421_v42 = vld [vmem:[%s1118_s11 + $0x1e0] sm:$0xff]  ;;  %v420_v46 = vld [vmem:[%s1118_s11 + $0x1d8] sm:$0xff]  ;;  %v419_v50 = vld [vmem:[%s1118_s11 + $0x1d0] sm:$0xff] }
  0x38   : > { %849 = vmatpush3.msra.mxu1 %v407_v36  ;;  %797 = vmatprep.subr.mxu0 %v390_v37  ;;  %v373_v43 = vld [vmem:[%s1118_s11 + $0x60] sm:$0xff]  ;;  %v372_v47 = vld [vmem:[%s1118_s11 + $0x58] sm:$0xff]  ;;  %v371_v51 = vld [vmem:[%s1118_s11 + $0x50] sm:$0xff] }
  0x39   : > { %850 = vmatprep.subr.mxu1 %v422_v38  ;;  %v405_v44 = vld [vmem:[%s1118_s11 + $0x160] sm:$0xff]  ;;  %798 = vmatpush3.msra.mxu0 %v374_v39  ;;  %v404_v48 = vld [vmem:[%s1118_s11 + $0x158] sm:$0xff]  ;;  %v403_v52 = vld [vmem:[%s1118_s11 + $0x150] sm:$0xff] }
  0x3a   : > { %851 = vmatpush3.msra.mxu1 %v406_v40  ;;  %799 = vmatprep.subr.mxu0 %v389_v41  ;;  %v386_v53 = vld [vmem:[%s1118_s11 + $0xc8] sm:$0xff]  ;;  %v385_v57 = vld [vmem:[%s1118_s11 + $0xc0] sm:$0xff]  ;;  %v384_v61 = vld [vmem:[%s1118_s11 + $0xb8] sm:$0xff] }
  0x3b   : > { %852 = vmatprep.subr.mxu1 %v421_v42  ;;  %800 = vmatpush3.msra.mxu0 %v373_v43  ;;  %v418_v54 = vld [vmem:[%s1118_s11 + $0x1c8] sm:$0xff]  ;;  %v417_v58 = vld [vmem:[%s1118_s11 + $0x1c0] sm:$0xff]  ;;  %v416_v62 = vld [vmem:[%s1118_s11 + $0x1b8] sm:$0xff] }
  0x3c   : > { %853 = vmatpush3.msra.mxu1 %v405_v44  ;;  %801 = vmatprep.subr.mxu0 %v388_v45  ;;  %v370_v55 = vld [vmem:[%s1118_s11 + $0x48] sm:$0xff]  ;;  %v369_v59 = vld [vmem:[%s1118_s11 + $0x40] sm:$0xff]  ;;  %v368_v63 = vld [vmem:[%s1118_s11 + $0x38] sm:$0xff] }
  0x3d   : > { %854 = vmatprep.subr.mxu1 %v420_v46  ;;  %802 = vmatpush3.msra.mxu0 %v372_v47  ;;  %v402_v56 = vld [vmem:[%s1118_s11 + $0x148] sm:$0xff]  ;;  %v401_v60 = vld [vmem:[%s1118_s11 + $0x140] sm:$0xff]  ;;  %v400_v0 = vld [vmem:[%s1118_s11 + $0x138] sm:$0xff] }
  0x3e   : > { %855 = vmatpush3.msra.mxu1 %v404_v48  ;;  %803 = vmatprep.subr.mxu0 %v387_v49  ;;  %v383_v1 = vld [vmem:[%s1118_s11 + $0xb0] sm:$0xff]  ;;  %v382_v5 = vld [vmem:[%s1118_s11 + $0xa8] sm:$0xff]  ;;  %v381_v9 = vld [vmem:[%s1118_s11 + $0xa0] sm:$0xff] }
  0x3f   : > { %856 = vmatprep.subr.mxu1 %v419_v50  ;;  %804 = vmatpush3.msra.mxu0 %v371_v51  ;;  %v415_v2 = vld [vmem:[%s1118_s11 + $0x1b0] sm:$0xff]  ;;  %v414_v6 = vld [vmem:[%s1118_s11 + $0x1a8] sm:$0xff]  ;;  %v413_v10 = vld [vmem:[%s1118_s11 + $0x1a0] sm:$0xff] }
  0x40   : > { %857 = vmatpush3.msra.mxu1 %v403_v52  ;;  %805 = vmatprep.subr.mxu0 %v386_v53  ;;  %v367_v3 = vld [vmem:[%s1118_s11 + $0x30] sm:$0xff]  ;;  %v366_v7 = vld [vmem:[%s1118_s11 + $0x28] sm:$0xff]  ;;  %v365_v11 = vld [vmem:[%s1118_s11 + $0x20] sm:$0xff] }
  0x41   : > { %858 = vmatprep.subr.mxu1 %v418_v54  ;;  %806 = vmatpush3.msra.mxu0 %v370_v55  ;;  %v399_v4 = vld [vmem:[%s1118_s11 + $0x130] sm:$0xff]  ;;  %v398_v8 = vld [vmem:[%s1118_s11 + $0x128] sm:$0xff]  ;;  %v397_v12 = vld [vmem:[%s1118_s11 + $0x120] sm:$0xff] }
  0x42   : > { %859 = vmatpush3.msra.mxu1 %v402_v56  ;;  %807 = vmatprep.subr.mxu0 %v385_v57  ;;  %v380_v13 = vld [vmem:[%s1118_s11 + $0x98] sm:$0xff]  ;;  %v379_v17 = vld [vmem:[%s1118_s11 + $0x90] sm:$0xff]  ;;  %v378_v21 = vld [vmem:[%s1118_s11 + $0x88] sm:$0xff] }
  0x43   : > { %860 = vmatprep.subr.mxu1 %v417_v58  ;;  %808 = vmatpush3.msra.mxu0 %v369_v59  ;;  %v412_v14 = vld [vmem:[%s1118_s11 + $0x198] sm:$0xff]  ;;  %v411_v18 = vld [vmem:[%s1118_s11 + $0x190] sm:$0xff]  ;;  %v410_v22 = vld [vmem:[%s1118_s11 + $0x188] sm:$0xff] }
  0x44   : > { %861 = vmatpush3.msra.mxu1 %v401_v60  ;;  %809 = vmatprep.subr.mxu0 %v384_v61  ;;  %v364_v15 = vld [vmem:[%s1118_s11 + $0x18] sm:$0xff]  ;;  %v363_v19 = vld [vmem:[%s1118_s11 + $0x10] sm:$0xff]  ;;  %v362_v23 = vld [vmem:[%s1118_s11 + $0x8] sm:$0xff] }
  0x45   : > { %862 = vmatprep.subr.mxu1 %v416_v62  ;;  %810 = vmatpush3.msra.mxu0 %v368_v63  ;;  %v396_v16 = vld [vmem:[%s1118_s11 + $0x118] sm:$0xff]  ;;  %v395_v20 = vld [vmem:[%s1118_s11 + $0x110] sm:$0xff]  ;;  %v394_v24 = vld [vmem:[%s1118_s11 + $0x108] sm:$0xff] }
  0x46   : > { %863 = vmatpush3.msra.mxu1 %v400_v0  ;;  %811 = vmatprep.subr.mxu0 %v383_v1  ;;  %v377_v25 = vld [vmem:[%s1118_s11 + $0x80] sm:$0xff]  ;;  %v336_v30 = vld [vmem:[%s1120_s12 + $0x18] sm:$0xff]  ;;  %v333_v31 = vld [vmem:[%s1120_s12] sm:$0xff] }
  0x47   : > { %864 = vmatprep.subr.mxu1 %v415_v2  ;;  %812 = vmatpush3.msra.mxu0 %v367_v3  ;;  %v409_v26 = vld [vmem:[%s1118_s11 + $0x180] sm:$0xff]  ;;  %v335_v32 = vld [vmem:[%s1120_s12 + $0x10] sm:$0xff]  ;;  %v340_v34 = vld [vmem:[%s1120_s12 + $0x38] sm:$0xff] }
  0x48   : > { %865 = vmatpush3.msra.mxu1 %v399_v4  ;;  %813 = vmatprep.subr.mxu0 %v382_v5  ;;  %v361_v27 = vld [vmem:[%s1118_s11] sm:$0xff]  ;;  %v337_v35 = vld [vmem:[%s1120_s12 + $0x20] sm:$0xff]  ;;  %v339_v36 = vld [vmem:[%s1120_s12 + $0x30] sm:$0xff] }
  0x49   : > { %866 = vmatprep.subr.mxu1 %v414_v6  ;;  %814 = vmatpush3.msra.mxu0 %v366_v7  ;;  %v334_v28 = vld [vmem:[%s1120_s12 + $0x8] sm:$0xff]  ;;  %v344_v38 = vld [vmem:[%s1120_s12 + $0x58] sm:$0xff]  ;;  %v341_v39 = vld [vmem:[%s1120_s12 + $0x40] sm:$0xff] }
  0x4a   : > { %867 = vmatpush3.msra.mxu1 %v398_v8  ;;  %815 = vmatprep.subr.mxu0 %v381_v9  ;;  %v393_v29 = vld [vmem:[%s1118_s11 + $0x100] sm:$0xff]  ;;  %v343_v40 = vld [vmem:[%s1120_s12 + $0x50] sm:$0xff]  ;;  %v348_v42 = vld [vmem:[%s1120_s12 + $0x78] sm:$0xff] }
  0x4b   : > { %868 = vmatprep.subr.mxu1 %v413_v10  ;;  %816 = vmatpush3.msra.mxu0 %v365_v11  ;;  %v338_v33 = vld [vmem:[%s1120_s12 + $0x28] sm:$0xff]  ;;  %v345_v43 = vld [vmem:[%s1120_s12 + $0x60] sm:$0xff]  ;;  %v347_v44 = vld [vmem:[%s1120_s12 + $0x70] sm:$0xff] }
  0x4c   : > { %869 = vmatpush3.msra.mxu1 %v397_v12  ;;  %817 = vmatprep.subr.mxu0 %v380_v13  ;;  %v342_v37 = vld [vmem:[%s1120_s12 + $0x48] sm:$0xff]  ;;  %v352_v46 = vld [vmem:[%s1120_s12 + $0x98] sm:$0xff]  ;;  %v349_v47 = vld [vmem:[%s1120_s12 + $0x80] sm:$0xff] }
  0x4d   : > { %870 = vmatprep.subr.mxu1 %v412_v14  ;;  %818 = vmatpush3.msra.mxu0 %v364_v15  ;;  %v346_v41 = vld [vmem:[%s1120_s12 + $0x68] sm:$0xff]  ;;  %v351_v48 = vld [vmem:[%s1120_s12 + $0x90] sm:$0xff]  ;;  %v356_v50 = vld [vmem:[%s1120_s12 + $0xb8] sm:$0xff] }
  0x4e   : > { %871 = vmatpush3.msra.mxu1 %v396_v16  ;;  %819 = vmatprep.subr.mxu0 %v379_v17  ;;  %v350_v45 = vld [vmem:[%s1120_s12 + $0x88] sm:$0xff]  ;;  %v353_v51 = vld [vmem:[%s1120_s12 + $0xa0] sm:$0xff]  ;;  %v355_v52 = vld [vmem:[%s1120_s12 + $0xb0] sm:$0xff] }
  0x4f   : > { %872 = vmatprep.subr.mxu1 %v411_v18  ;;  %820 = vmatpush3.msra.mxu0 %v363_v19  ;;  %v354_v49 = vld [vmem:[%s1120_s12 + $0xa8] sm:$0xff]  ;;  %v360_v54 = vld [vmem:[%s1120_s12 + $0xd8] sm:$0xff]  ;;  %v357_v55 = vld [vmem:[%s1120_s12 + $0xc0] sm:$0xff] }
  0x50   : > { %873 = vmatpush3.msra.mxu1 %v395_v20  ;;  %821 = vmatprep.subr.mxu0 %v378_v21  ;;  %v358_v53 = vld [vmem:[%s1120_s12 + $0xc8] sm:$0xff]  ;;  %v359_v56 = vld [vmem:[%s1120_s12 + $0xd0] sm:$0xff]  ;;  %v328_v17 = vld [vmem:[#allocation2 + $0x10] sm:$0xff] }
  0x51   : > { %874 = vmatprep.subr.mxu1 %v410_v22  ;;  %822 = vmatpush3.msra.mxu0 %v362_v23  ;;  %v326_v63 = vld [vmem:[#allocation2] sm:$0xff]  ;;  %v327_v8 = vld [vmem:[#allocation2 + $0x8] sm:$0xff] }
  0x52   : > { %875 = vmatpush3.msra.mxu1 %v394_v24  ;;  %823 = vmatprep.subr.mxu0 %v377_v25 }
  0x53   : > { %876 = vmatprep.subr.mxu1 %v409_v26  ;;  %824 = vmatpush3.msra.mxu0 %v361_v27  ;;  %v329_v26 = vld [vmem:[#allocation2 + $0x18] sm:$0xff] }
  0x54   : > { %489 = vmatprep.mubr.f32.mxu0 %v334_v28  ;;  %877 = vmatpush3.msra.mxu1 %v393_v29 }
  0x55   : > { %589 = vmatprep.mubr.f32.mxu1 %v336_v30  ;;  %490 = vmatmul.mubr.f32.vlgmr.msra.gmra.mxu0 %v333_v31 }
  0x56   : > { %590 = vmatmul.mubr.f32.vlgmr.msra.gmra.mxu1 %v335_v32  ;;  %494 = vmatprep.mubr.f32.mxu0 %v338_v33 }
  0x57   : > { %594 = vmatprep.mubr.f32.mxu1 %v340_v34 }
  0x59   : > { %495 = vmatmul.mubr.f32.gmra.mxu0 %v337_v35  ;;  %v330_v35 = vld [vmem:[#allocation2 + $0x20] sm:$0xff] }
  0x5a   : > { %595 = vmatmul.mubr.f32.gmra.mxu1 %v339_v36  ;;  %499 = vmatprep.mubr.f32.mxu0 %v342_v37 }
  0x5b   : > { %599 = vmatprep.mubr.f32.mxu1 %v344_v38 }
  0x5d   : > { %500 = vmatmul.mubr.f32.gmra.mxu0 %v341_v39 }
  0x5e   : > { %600 = vmatmul.mubr.f32.gmra.mxu1 %v343_v40  ;;  %504 = vmatprep.mubr.f32.mxu0 %v346_v41 }
  0x5f   : > { %604 = vmatprep.mubr.f32.mxu1 %v348_v42 }
  0x61   : > { %505 = vmatmul.mubr.f32.gmra.mxu0 %v345_v43 }
  0x62   : > { %605 = vmatmul.mubr.f32.gmra.mxu1 %v347_v44  ;;  %509 = vmatprep.mubr.f32.mxu0 %v350_v45  ;;  %v331_v44 = vld [vmem:[#allocation2 + $0x28] sm:$0xff] }
  0x63   : > { %609 = vmatprep.mubr.f32.mxu1 %v352_v46 }
  0x65   : > { %510 = vmatmul.mubr.f32.gmra.mxu0 %v349_v47 }
  0x66   : > { %610 = vmatmul.mubr.f32.gmra.mxu1 %v351_v48  ;;  %514 = vmatprep.mubr.f32.mxu0 %v354_v49 }
  0x67   : > { %614 = vmatprep.mubr.f32.mxu1 %v356_v50 }
  0x69   : > { %515 = vmatmul.mubr.f32.gmra.mxu0 %v353_v51 }
  0x6a   : > { %615 = vmatmul.mubr.f32.gmra.mxu1 %v355_v52  ;;  %519 = vmatprep.mubr.f32.mxu0 %v358_v53  ;;  %v332_v53 = vld [vmem:[#allocation2 + $0x30] sm:$0xff] }
  0x6b   : > { %619 = vmatprep.mubr.f32.mxu1 %v360_v54 }
  0x6d   : > { %520 = vmatmul.mubr.f32.gmra.mxu0 %v357_v55 }
  0x6e   : > { %620 = vmatmul.mubr.f32.gmra.mxu1 %v359_v56 }
 0x115   : > { %v825_v57 = vpop.f32.mrf.mxu0 }
 0x116   : > { %v878_v58 = vpop.f32.mrf.mxu1 }
 0x117   : > { %v826_v59 = vpop.f32.mrf.mxu0 }
 0x118   : > { %v879_v60 = vpop.f32.mrf.mxu1  ;;  %v827_v61 = vadd.f32 %v826_v59, %v825_v57 }
 0x119   : > { %v880_v62 = vadd.f32 %v879_v60, %v878_v58  ;;  %v828_v0 = vpop.f32.mrf.mxu0 }
 0x11a   : > { %v881_v1 = vpop.f32.mrf.mxu1 }
 0x11b   : > { %v592_v2 = vadd.f32 %v880_v62, %v827_v61  ;;  %v829_v3 = vpop.f32.mrf.mxu0 }
 0x11c   : > { %v882_v4 = vpop.f32.mrf.mxu1  ;;  %v830_v6 = vadd.f32 %v829_v3, %v828_v0 }
 0x11d   : > { %v625_v5 = vadd.f32 %v592_v2, %v326_v63  ;;  %v883_v7 = vadd.f32 %v882_v4, %v881_v1  ;;  %v831_v9 = vpop.f32.mrf.mxu0 }
 0x11e   : > { %v884_v10 = vpop.f32.mrf.mxu1 }
 0x11f   : > { %633 = vst.msk [vmem:[#allocation2] sm:$0xff] %vm632_vm1, %v625_v5  ;;  %v597_v11 = vadd.f32 %v883_v7, %v830_v6  ;;  %v832_v12 = vpop.f32.mrf.mxu0 }
 0x120   : > { %v885_v13 = vpop.f32.mrf.mxu1  ;;  %v833_v15 = vadd.f32 %v832_v12, %v831_v9 }
 0x121   : > { %v626_v14 = vadd.f32 %v597_v11, %v327_v8  ;;  %v886_v16 = vadd.f32 %v885_v13, %v884_v10  ;;  %v834_v18 = vpop.f32.mrf.mxu0 }
 0x122   : > { %v887_v19 = vpop.f32.mrf.mxu1 }
 0x123   : > { %634 = vst.msk [vmem:[#allocation2 + $0x8] sm:$0xff] %vm632_vm1, %v626_v14  ;;  %v602_v20 = vadd.f32 %v886_v16, %v833_v15  ;;  %v835_v21 = vpop.f32.mrf.mxu0 }
 0x124   : > { %v888_v22 = vpop.f32.mrf.mxu1  ;;  %v836_v24 = vadd.f32 %v835_v21, %v834_v18 }
 0x125   : > { %v627_v23 = vadd.f32 %v602_v20, %v328_v17  ;;  %v889_v25 = vadd.f32 %v888_v22, %v887_v19  ;;  %v837_v27 = vpop.f32.mrf.mxu0 }
 0x126   : > { %v890_v28 = vpop.f32.mrf.mxu1 }
 0x127   : > { %635 = vst.msk [vmem:[#allocation2 + $0x10] sm:$0xff] %vm632_vm1, %v627_v23  ;;  %v607_v29 = vadd.f32 %v889_v25, %v836_v24  ;;  %v838_v30 = vpop.f32.mrf.mxu0 }
 0x128   : > { %v891_v31 = vpop.f32.mrf.mxu1  ;;  %v839_v33 = vadd.f32 %v838_v30, %v837_v27 }
 0x129   : > { %v628_v32 = vadd.f32 %v607_v29, %v329_v26  ;;  %v892_v34 = vadd.f32 %v891_v31, %v890_v28  ;;  %v840_v36 = vpop.f32.mrf.mxu0 }
 0x12a   : > { %v893_v37 = vpop.f32.mrf.mxu1 }
 0x12b   : > { %636 = vst.msk [vmem:[#allocation2 + $0x18] sm:$0xff] %vm632_vm1, %v628_v32  ;;  %v612_v38 = vadd.f32 %v892_v34, %v839_v33  ;;  %v841_v39 = vpop.f32.mrf.mxu0 }
 0x12c   : > { %v894_v40 = vpop.f32.mrf.mxu1  ;;  %v842_v42 = vadd.f32 %v841_v39, %v840_v36 }
 0x12d   : > { %v629_v41 = vadd.f32 %v612_v38, %v330_v35  ;;  %v895_v43 = vadd.f32 %v894_v40, %v893_v37  ;;  %v843_v45 = vpop.f32.mrf.mxu0 }
 0x12e   : > { %v896_v46 = vpop.f32.mrf.mxu1 }
 0x12f   : > { %637 = vst.msk [vmem:[#allocation2 + $0x20] sm:$0xff] %vm632_vm1, %v629_v41  ;;  %v617_v47 = vadd.f32 %v895_v43, %v842_v42  ;;  %v844_v48 = vpop.f32.mrf.mxu0 }
 0x130   : > { %v897_v49 = vpop.f32.mrf.mxu1  ;;  %v845_v51 = vadd.f32 %v844_v48, %v843_v45 }
 0x131   : > { %v630_v50 = vadd.f32 %v617_v47, %v331_v44  ;;  %v898_v52 = vadd.f32 %v897_v49, %v896_v46 }
 0x133   : > { %638 = vst.msk [vmem:[#allocation2 + $0x28] sm:$0xff] %vm632_vm1, %v630_v50  ;;  %v622_v54 = vadd.f32 %v898_v52, %v845_v51  ;;  %643 = sbr.rel (%p785_p11) target bundleno = 326 (0x146), region = 67 }
 0x135   : > { %v631_v55 = vadd.f32 %v622_v54, %v332_v53 }
 0x137   : > { %639 = vst.msk [vmem:[#allocation2 + $0x30] sm:$0xff] %vm632_vm1, %v631_v55 }
 0x138   : > { %v644_v56 = vld [vmem:[#allocation2] sm:$0xff]  ;;  %v645_v60 = vld [vmem:[#allocation2 + $0x8] sm:$0xff]  ;;  %v646_v61 = vld [vmem:[#allocation2 + $0x10] sm:$0xff] }
 0x139   : > { %v786_v57 = vld [vmem:[%s1274_s2] ss:$0 sm:$0xff]  ;;  %v647_v62 = vld [vmem:[#allocation2 + $0x18] sm:$0xff] }
 0x13a   : > { %v787_v58 = vld [vmem:[%s1275_s3] ss:$0 sm:$0xff]  ;;  %v658_v59 = vmul.f32 %v786_v57, %v644_v56  ;;  %v659_v63 = vmul.f32 %v786_v57, %v645_v60  ;;  %v660_v0 = vmul.f32 %v786_v57, %v646_v61  ;;  %v661_v1 = vmul.f32 %v786_v57, %v647_v62  ;;  %v649_v3 = vld [vmem:[#allocation2 + $0x28] sm:$0xff] }
 0x13b   : > { %v648_v2 = vld [vmem:[#allocation2 + $0x20] sm:$0xff]  ;;  %v663_v7 = vmul.f32 %v786_v57, %v649_v3 }
 0x13c   : > { %v672_v5 = vadd.f32 %v787_v58, %v658_v59  ;;  %v662_v6 = vmul.f32 %v786_v57, %v648_v2  ;;  %v673_v9 = vadd.f32 %v787_v58, %v659_v63  ;;  %v674_v10 = vadd.f32 %v787_v58, %v660_v0 }
 0x13d   : > { %v675_v11 = vadd.f32 %v787_v58, %v661_v1  ;;  %v677_v14 = vadd.f32 %v787_v58, %v663_v7 }
 0x13e   : > { %v650_v4 = vld [vmem:[#allocation2 + $0x30] sm:$0xff]  ;;  %v679_v12 = vmax.f32 %v672_v5, 0.0  ;;  %v676_v13 = vadd.f32 %v787_v58, %v662_v6  ;;  %v680_v16 = vmax.f32 %v673_v9, 0.0  ;;  %v681_v17 = vmax.f32 %v674_v10, 0.0 }
 0x13f   : > { %v664_v8 = vmul.f32 %v786_v57, %v650_v4  ;;  %v682_v18 = vmax.f32 %v675_v11, 0.0  ;;  %v684_v20 = vmax.f32 %v677_v14, 0.0 }
 0x140   : > { %686 = vst.msk [vmem:[%s1276_s4] sm:$0xff] %vm632_vm1, %v679_v12  ;;  %v683_v19 = vmax.f32 %v676_v13, 0.0  ;;  %687 = vst.msk [vmem:[%s1276_s4 + $0x8] sm:$0xff] %vm632_vm1, %v680_v16 }
 0x141   : > { %v678_v15 = vadd.f32 %v787_v58, %v664_v8  ;;  %688 = vst.msk [vmem:[%s1276_s4 + $0x10] sm:$0xff] %vm632_vm1, %v681_v17  ;;  %689 = vst.msk [vmem:[%s1276_s4 + $0x18] sm:$0xff] %vm632_vm1, %v682_v18 }
 0x142   : > { %690 = vst.msk [vmem:[%s1276_s4 + $0x20] sm:$0xff] %vm632_vm1, %v683_v19  ;;  %691 = vst.msk [vmem:[%s1276_s4 + $0x28] sm:$0xff] %vm632_vm1, %v684_v20 }
 0x143   : > { %v685_v21 = vmax.f32 %v678_v15, 0.0 }
 0x145   : > { %692 = vst.msk [vmem:[%s1276_s4 + $0x30] sm:$0xff] %vm632_vm1, %v685_v21 }
 0x146 PF: > { %s14_s19 = sadd.s32 1, %s980_s19   ;;  %s1277_s15 = smov %s968_s16 }
 0x147   : > { %p11_p12 = scmp.ge.s32.totalorder %s14_s19, 9   ;;  %s1278_s16 = smov %s1043_s23 }
 0x148   : > { %s1279_s17 = smov %s976_s18  ;;  %s1280_s18 = smov %s1282_s20 }
 0x149   :  { %13 = sbr.rel (!%p11_p12) target bundleno = 3 (0x3), region = 105 }

// kernel: feature_regression_forward.5
= control target key start
LH: loop header
LB: loop body
LE: loop exit
PB: predicated region body
PF: predicated region fallthrough
CT: control target
= control target key end

     0   :  { %s723_s15 = smov 0   ;;  %s725_s16 = smov 0   ;;  %s843_s0 = inlined_call_operand.vmem [shape: f32[8,2048], index: 0, kind: input, shape index: {}]   ;;  %s844_s1 = inlined_call_operand.vmem [shape: f32[2048,6], index: 1, kind: input, shape index: {}]   ;;  %s845_s2 = inlined_call_operand.vmem [shape: f32[1,6], index: 2, kind: input, shape index: {}]   ;;  %s846_s3 = inlined_call_operand.vmem [shape: f32[1,6], index: 3, kind: input, shape index: {}]   ;;  %s847_s4 = inlined_call_operand.vmem [shape: f32[8,6], index: 4, kind: output, shape index: {}]  }
   0x1   :  { %s727_s17 = smov 0  }
   0x2 LB: > { %s23_s18 = sadd.s32 1, %s691_s16  ;;  %p566_p0 = scmp.ge.s32.totalorder %s695_s17, 1  ;;  %s695_s17 = sphi %s727_s17, %s14_s17   ;;  %s691_s16 = sphi %s725_s16, %s849_s16   ;;  %s687_s15 = sphi %s723_s15, %s848_s15  }
   0x3   : > { %p24_p1 = scmp.ge.s32.totalorder %s23_s18, 4  ;;  %p192_p2 = scmp.lt.s32.totalorder %s695_s17, 5 }
   0x5   : > { %s851_s18 = smov (%p24_p1, %s23_s18), 0  ;;  %p193_p3 = pnand %p566_p0, %p192_p2 }
   0x6   : > { %s567_s19 = sshll.u32 (!%p193_p3), %s687_s15, 2  ;;  %s569_s20 = sshll.u32 (!%p193_p3), %s687_s15, 6 }
   0x7   : > { %196 = sbr.rel (%p193_p3) target bundleno = 272 (0x110), region = 36  ;;  %p229_p4 = scmp.lt.s32.totalorder (!%p193_p3), %s567_s19, 15 }
   0x8   : > { %p237_p5 = scmp.lt.s32.totalorder (!%p193_p3), %s569_s20, 255  ;;  %p571_p6 = scmp.ne.s32.totalorder (!%p193_p3), %s687_s15, 0 }
   0xc   : > { %s853_s19 = smov (!%p229_p4, %s567_s19), 15  ;;  %s855_s20 = smov (!%p237_p5, %s569_s20), 255 }
   0xd   : > { %s568_s21 = sshll.u32 %s853_s19, 3  ;;  %s570_s25 = sshll.u32 %s855_s20, 3 }
   0xe   : > { %s748_s24 = scalar_lea.vmem %s843_s0, %s568_s21  ;;  %s753_s28 = scalar_lea.vmem %s844_s1, %s570_s25 }
   0xf   : > { %249 = sbr.rel (%p571_p6) target bundleno = 22 (0x16), region = 40 }
  0x14   : > { %vm250_vm0 = vcmask 48128   ;;  %v697_v0 = vmov 0.0  }
  0x15   : > { %251 = vst.msk [vmem:[#allocation2] sm:$0xff] %vm250_vm0, %v697_v0 }
  0x16 PF: > { %v288_v1 = vld [vmem:[%s753_s28 + $0xf8] sm:$0xff]  ;;  %v287_v5 = vld [vmem:[%s753_s28 + $0xf0] sm:$0xff]  ;;  %v286_v9 = vld [vmem:[%s753_s28 + $0xe8] sm:$0xff]  ;;  %vm462_vm1 = vcmask 48128   ;;  %p572_p7 = scmp.ne.s32.totalorder %s687_s15, 3 }
  0x17   : > { %v320_v2 = vld [vmem:[%s753_s28 + $0x1f8] sm:$0xff]  ;;  %578 = vmatprep.subr.mxu0 %v288_v1  ;;  %v319_v6 = vld [vmem:[%s753_s28 + $0x1f0] sm:$0xff]  ;;  %v318_v10 = vld [vmem:[%s753_s28 + $0x1e8] sm:$0xff] }
  0x18   : > { %v272_v3 = vld [vmem:[%s753_s28 + $0x78] sm:$0xff]  ;;  %613 = vmatprep.subr.mxu1 %v320_v2  ;;  %v271_v7 = vld [vmem:[%s753_s28 + $0x70] sm:$0xff]  ;;  %v270_v11 = vld [vmem:[%s753_s28 + $0x68] sm:$0xff] }
  0x19   : > { %v304_v4 = vld [vmem:[%s753_s28 + $0x178] sm:$0xff]  ;;  %579 = vmatpush3.msra.mxu0 %v272_v3  ;;  %v303_v8 = vld [vmem:[%s753_s28 + $0x170] sm:$0xff]  ;;  %v302_v12 = vld [vmem:[%s753_s28 + $0x168] sm:$0xff] }
  0x1a   : > { %614 = vmatpush3.msra.mxu1 %v304_v4  ;;  %580 = vmatprep.subr.mxu0 %v287_v5  ;;  %v285_v13 = vld [vmem:[%s753_s28 + $0xe0] sm:$0xff]  ;;  %v284_v17 = vld [vmem:[%s753_s28 + $0xd8] sm:$0xff]  ;;  %v283_v21 = vld [vmem:[%s753_s28 + $0xd0] sm:$0xff] }
  0x1b   : > { %615 = vmatprep.subr.mxu1 %v319_v6  ;;  %581 = vmatpush3.msra.mxu0 %v271_v7  ;;  %v317_v14 = vld [vmem:[%s753_s28 + $0x1e0] sm:$0xff]  ;;  %v316_v18 = vld [vmem:[%s753_s28 + $0x1d8] sm:$0xff]  ;;  %v315_v22 = vld [vmem:[%s753_s28 + $0x1d0] sm:$0xff] }
  0x1c   : > { %616 = vmatpush3.msra.mxu1 %v303_v8  ;;  %582 = vmatprep.subr.mxu0 %v286_v9  ;;  %v269_v15 = vld [vmem:[%s753_s28 + $0x60] sm:$0xff]  ;;  %v268_v19 = vld [vmem:[%s753_s28 + $0x58] sm:$0xff]  ;;  %v267_v23 = vld [vmem:[%s753_s28 + $0x50] sm:$0xff] }
  0x1d   : > { %617 = vmatprep.subr.mxu1 %v318_v10  ;;  %v301_v16 = vld [vmem:[%s753_s28 + $0x160] sm:$0xff]  ;;  %583 = vmatpush3.msra.mxu0 %v270_v11  ;;  %v300_v20 = vld [vmem:[%s753_s28 + $0x158] sm:$0xff]  ;;  %v299_v24 = vld [vmem:[%s753_s28 + $0x150] sm:$0xff] }
  0x1e   : > { %618 = vmatpush3.msra.mxu1 %v302_v12  ;;  %584 = vmatprep.subr.mxu0 %v285_v13  ;;  %v282_v25 = vld [vmem:[%s753_s28 + $0xc8] sm:$0xff]  ;;  %v281_v29 = vld [vmem:[%s753_s28 + $0xc0] sm:$0xff]  ;;  %v280_v33 = vld [vmem:[%s753_s28 + $0xb8] sm:$0xff] }
  0x1f   : > { %619 = vmatprep.subr.mxu1 %v317_v14  ;;  %585 = vmatpush3.msra.mxu0 %v269_v15  ;;  %v314_v26 = vld [vmem:[%s753_s28 + $0x1c8] sm:$0xff]  ;;  %v313_v30 = vld [vmem:[%s753_s28 + $0x1c0] sm:$0xff]  ;;  %v312_v34 = vld [vmem:[%s753_s28 + $0x1b8] sm:$0xff] }
  0x20   : > { %620 = vmatpush3.msra.mxu1 %v301_v16  ;;  %586 = vmatprep.subr.mxu0 %v284_v17  ;;  %v266_v27 = vld [vmem:[%s753_s28 + $0x48] sm:$0xff]  ;;  %v265_v31 = vld [vmem:[%s753_s28 + $0x40] sm:$0xff]  ;;  %v264_v35 = vld [vmem:[%s753_s28 + $0x38] sm:$0xff] }
  0x21   : > { %621 = vmatprep.subr.mxu1 %v316_v18  ;;  %587 = vmatpush3.msra.mxu0 %v268_v19  ;;  %v298_v28 = vld [vmem:[%s753_s28 + $0x148] sm:$0xff]  ;;  %v297_v32 = vld [vmem:[%s753_s28 + $0x140] sm:$0xff]  ;;  %v296_v36 = vld [vmem:[%s753_s28 + $0x138] sm:$0xff] }
  0x22   : > { %622 = vmatpush3.msra.mxu1 %v300_v20  ;;  %588 = vmatprep.subr.mxu0 %v283_v21  ;;  %v279_v37 = vld [vmem:[%s753_s28 + $0xb0] sm:$0xff]  ;;  %v278_v41 = vld [vmem:[%s753_s28 + $0xa8] sm:$0xff]  ;;  %v277_v45 = vld [vmem:[%s753_s28 + $0xa0] sm:$0xff] }
  0x23   : > { %623 = vmatprep.subr.mxu1 %v315_v22  ;;  %589 = vmatpush3.msra.mxu0 %v267_v23  ;;  %v311_v38 = vld [vmem:[%s753_s28 + $0x1b0] sm:$0xff]  ;;  %v310_v42 = vld [vmem:[%s753_s28 + $0x1a8] sm:$0xff]  ;;  %v309_v46 = vld [vmem:[%s753_s28 + $0x1a0] sm:$0xff] }
  0x24   : > { %624 = vmatpush3.msra.mxu1 %v299_v24  ;;  %590 = vmatprep.subr.mxu0 %v282_v25  ;;  %v263_v39 = vld [vmem:[%s753_s28 + $0x30] sm:$0xff]  ;;  %v262_v43 = vld [vmem:[%s753_s28 + $0x28] sm:$0xff]  ;;  %v261_v47 = vld [vmem:[%s753_s28 + $0x20] sm:$0xff] }
  0x25   : > { %625 = vmatprep.subr.mxu1 %v314_v26  ;;  %591 = vmatpush3.msra.mxu0 %v266_v27  ;;  %v295_v40 = vld [vmem:[%s753_s28 + $0x130] sm:$0xff]  ;;  %v294_v44 = vld [vmem:[%s753_s28 + $0x128] sm:$0xff]  ;;  %v293_v48 = vld [vmem:[%s753_s28 + $0x120] sm:$0xff] }
  0x26   : > { %626 = vmatpush3.msra.mxu1 %v298_v28  ;;  %592 = vmatprep.subr.mxu0 %v281_v29  ;;  %v276_v49 = vld [vmem:[%s753_s28 + $0x98] sm:$0xff]  ;;  %v275_v53 = vld [vmem:[%s753_s28 + $0x90] sm:$0xff]  ;;  %v274_v57 = vld [vmem:[%s753_s28 + $0x88] sm:$0xff] }
  0x27   : > { %627 = vmatprep.subr.mxu1 %v313_v30  ;;  %593 = vmatpush3.msra.mxu0 %v265_v31  ;;  %v308_v50 = vld [vmem:[%s753_s28 + $0x198] sm:$0xff]  ;;  %v307_v54 = vld [vmem:[%s753_s28 + $0x190] sm:$0xff]  ;;  %v306_v58 = vld [vmem:[%s753_s28 + $0x188] sm:$0xff] }
  0x28   : > { %628 = vmatpush3.msra.mxu1 %v297_v32  ;;  %594 = vmatprep.subr.mxu0 %v280_v33  ;;  %v260_v51 = vld [vmem:[%s753_s28 + $0x18] sm:$0xff]  ;;  %v259_v55 = vld [vmem:[%s753_s28 + $0x10] sm:$0xff]  ;;  %v258_v59 = vld [vmem:[%s753_s28 + $0x8] sm:$0xff] }
  0x29   : > { %629 = vmatprep.subr.mxu1 %v312_v34  ;;  %595 = vmatpush3.msra.mxu0 %v264_v35  ;;  %v292_v52 = vld [vmem:[%s753_s28 + $0x118] sm:$0xff]  ;;  %v291_v56 = vld [vmem:[%s753_s28 + $0x110] sm:$0xff]  ;;  %v290_v60 = vld [vmem:[%s753_s28 + $0x108] sm:$0xff] }
  0x2a   : > { %630 = vmatpush3.msra.mxu1 %v296_v36  ;;  %596 = vmatprep.subr.mxu0 %v279_v37  ;;  %v273_v61 = vld [vmem:[%s753_s28 + $0x80] sm:$0xff]  ;;  %v254_v0 = vld [vmem:[%s748_s24 + $0x8] sm:$0xff]  ;;  %v256_v2 = vld [vmem:[%s748_s24 + $0x18] sm:$0xff] }
  0x2b   : > { %631 = vmatprep.subr.mxu1 %v311_v38  ;;  %597 = vmatpush3.msra.mxu0 %v263_v39  ;;  %v305_v62 = vld [vmem:[%s753_s28 + $0x180] sm:$0xff]  ;;  %v255_v4 = vld [vmem:[%s748_s24 + $0x10] sm:$0xff] }
  0x2c   : > { %632 = vmatpush3.msra.mxu1 %v295_v40  ;;  %598 = vmatprep.subr.mxu0 %v278_v41  ;;  %v257_v63 = vld [vmem:[%s753_s28] sm:$0xff] }
  0x2d   : > { %633 = vmatprep.subr.mxu1 %v310_v42  ;;  %599 = vmatpush3.msra.mxu0 %v262_v43  ;;  %v289_v1 = vld [vmem:[%s753_s28 + $0x100] sm:$0xff] }
  0x2e   : > { %634 = vmatpush3.msra.mxu1 %v294_v44  ;;  %600 = vmatprep.subr.mxu0 %v277_v45  ;;  %v253_v3 = vld [vmem:[%s748_s24] sm:$0xff] }
  0x2f   : > { %635 = vmatprep.subr.mxu1 %v309_v46  ;;  %601 = vmatpush3.msra.mxu0 %v261_v47  ;;  %v252_v11 = vld [vmem:[#allocation2] sm:$0xff] }
  0x30   : > { %636 = vmatpush3.msra.mxu1 %v293_v48  ;;  %602 = vmatprep.subr.mxu0 %v276_v49 }
  0x31   : > { %637 = vmatprep.subr.mxu1 %v308_v50  ;;  %603 = vmatpush3.msra.mxu0 %v260_v51 }
  0x32   : > { %638 = vmatpush3.msra.mxu1 %v292_v52  ;;  %604 = vmatprep.subr.mxu0 %v275_v53 }
  0x33   : > { %639 = vmatprep.subr.mxu1 %v307_v54  ;;  %605 = vmatpush3.msra.mxu0 %v259_v55 }
  0x34   : > { %640 = vmatpush3.msra.mxu1 %v291_v56  ;;  %606 = vmatprep.subr.mxu0 %v274_v57 }
  0x35   : > { %641 = vmatprep.subr.mxu1 %v306_v58  ;;  %607 = vmatpush3.msra.mxu0 %v258_v59 }
  0x36   : > { %642 = vmatpush3.msra.mxu1 %v290_v60  ;;  %608 = vmatprep.subr.mxu0 %v273_v61 }
  0x37   : > { %643 = vmatprep.subr.mxu1 %v305_v62  ;;  %609 = vmatpush3.msra.mxu0 %v257_v63 }
  0x38   : > { %385 = vmatprep.mubr.f32.mxu0 %v254_v0  ;;  %644 = vmatpush3.msra.mxu1 %v289_v1 }
  0x39   : > { %455 = vmatprep.mubr.f32.mxu1 %v256_v2  ;;  %386 = vmatmul.mubr.f32.vlgmr.msra.gmra.mxu0 %v253_v3 }
  0x3a   : > { %456 = vmatmul.mubr.f32.vlgmr.msra.gmra.mxu1 %v255_v4 }
  0xf9   : > { %v610_v5 = vpop.f32.mrf.mxu0 }
  0xfa   : > { %v645_v6 = vpop.f32.mrf.mxu1 }
  0xfb   : > { %v611_v7 = vpop.f32.mrf.mxu0 }
  0xfc   : > { %v646_v8 = vpop.f32.mrf.mxu1  ;;  %v612_v9 = vadd.f32 %v611_v7, %v610_v5 }
  0xfd   : > { %v647_v10 = vadd.f32 %v646_v8, %v645_v6 }
  0xff   : > { %v458_v12 = vadd.f32 %v647_v10, %v612_v9  ;;  %467 = sbr.rel (%p572_p7) target bundleno = 272 (0x110), region = 44 }
 0x101   : > { %v461_v13 = vadd.f32 %v458_v12, %v252_v11 }
 0x103   : > { %463 = vst.msk [vmem:[#allocation2] sm:$0xff] %vm462_vm1, %v461_v13 }
 0x104   : > { %v573_v15 = vld [vmem:[%s845_s2] ss:$0 sm:$0xff] }
 0x105   : > { %v574_v16 = vld [vmem:[%s846_s3] ss:$0 sm:$0xff] }
 0x10a   : > { %v468_v14 = vld [vmem:[#allocation2] sm:$0xff] }
 0x10b   : > { %v476_v17 = vmul.f32 %v573_v15, %v468_v14 }
 0x10d   : > { %v484_v18 = vadd.f32 %v574_v16, %v476_v17 }
 0x10f   : > { %485 = vst.msk [vmem:[%s847_s4] sm:$0xff] %vm462_vm1, %v484_v18 }
 0x110 PF: > { %s14_s17 = sadd.s32 1, %s695_s17   ;;  %s848_s15 = smov %s691_s16 }
 0x111   : > { %p11_p8 = scmp.ge.s32.totalorder %s14_s17, 6   ;;  %s849_s16 = smov %s851_s18 }
 0x113   :  { %13 = sbr.rel (!%p11_p8) target bundleno = 2 (0x2), region = 77 }

</bundles_post_ra>
